<compile_context>
chip_gen: v5e
topology: v5e:2x2
jax: 0.10.0
libtpu: 0.0.40
codegen_flags: <defaults>
</compile_context>

<pallas_src>
import functools

import jax
import jax.numpy as jnp
from jax import lax
from jax.experimental import pallas as pl
from jax.experimental.pallas import tpu as pltpu

# ---------------- model hyper-params (small, consistent with the module) ---
D_MODEL   = 32      # encoder.d_model
SEQ_LEN   = 8       # length of prev_items / prev_users sequences
BATCH     = 8       # batch size (K % B == 0 required by update_queues)
QUEUE_K   = 128     # MoCo-style queue size (K)
NUM_USERS = 64
NUM_ITEMS = 64
TEMP      = 0.07    # T
BN_EPS    = 1e-5    # nn.BatchNorm1d eps
NORM_EPS  = 1e-12   # F.normalize eps
SLAB_W    = 128     # lane-dense packed output: [rep(D) | proj(D) | pos(1) | pad]


# ------------------------------- fused kernel -------------------------------
def _felrec_fused_kernel(idx_ref, msk_ref, itab_ref, utab_ref, tok_ref,
                         enc_w_ref, enc_b_ref,
                         w1_ref, b1_ref, gamma_ref, beta_ref, w2_ref, b2_ref,
                         iq_t_ref, uq_t_ref,
                         slab_ref, neg_ref, *, inv_t):
    # Stacked row layout: rows 0:B = user branch (item tokens/table/queue),
    # rows B:2B = item branch. Item-branch indices are pre-offset by N_items.
    B2, L = idx_ref.shape
    B = B2 // 2
    D = enc_w_ref.shape[0]
    NT = itab_ref.shape[0] + utab_ref.shape[0]          # 2N = 128
    f32 = jnp.float32

    row_is_user = (lax.broadcasted_iota(jnp.int32, (B2, 1), 0) < B).astype(f32)

    # ---- fused embedding gather + token add + masked-mean pool ------------
    msk = msk_ref[...]                                   # (2B, L)
    denom = jnp.maximum(jnp.sum(msk, axis=1, keepdims=True), 1.0)
    wgt = msk / denom                                    # (2B, L)

    table_all = jnp.concatenate([itab_ref[...], utab_ref[...]], axis=0)  # (2N,D)
    iota_n = lax.broadcasted_iota(jnp.int32, (B2, L, NT), 2)
    onehot_w = jnp.where(idx_ref[...][:, :, None] == iota_n,
                         wgt[:, :, None], 0.0)           # (2B, L, 2N)
    gw = jnp.sum(onehot_w, axis=1)                       # (2B, 2N)
    pooled = jnp.dot(gw, table_all, preferred_element_type=f32)   # (2B, D)

    coef = jnp.sum(wgt, axis=1, keepdims=True)           # (2B, 1): 1 if any valid
    tok_rows = row_is_user * tok_ref[0] + (1.0 - row_is_user) * tok_ref[1]
    pooled = pooled + coef * tok_rows

    # ---- encoder stand-in: shared Linear + tanh ----------------------------
    # TODO(synk): FELRecQ's encoder is injected at construction; a masked-mean
    # + Linear + tanh encoder with output dim d_model is used as a stand-in.
    rep_all = jnp.tanh(jnp.dot(pooled, enc_w_ref[...],
                               preferred_element_type=f32) + enc_b_ref[...])

    # ---- projection MLPs merged via block-diagonal weights -----------------
    # mlp(): Linear -> BatchNorm1d (training batch stats, biased var)
    #        -> ReLU -> Linear, then F.normalize(dim=1, p=2)
    zD = jnp.zeros((D, D), f32)
    w1_big = jnp.concatenate(
        [jnp.concatenate([w1_ref[0], zD], axis=1),
         jnp.concatenate([zD, w1_ref[1]], axis=1)], axis=0)        # (2D, 2D)
    w2_big = jnp.concatenate(
        [jnp.concatenate([w2_ref[0], zD], axis=1),
         jnp.concatenate([zD, w2_ref[1]], axis=1)], axis=0)        # (2D, 2D)
    b1_big = jnp.concatenate([b1_ref[0], b1_ref[1]], axis=1)       # (1, 2D)
    b2_big = jnp.concatenate([b2_ref[0], b2_ref[1]], axis=1)
    g_big = jnp.concatenate([gamma_ref[0], gamma_ref[1]], axis=1)
    be_big = jnp.concatenate([beta_ref[0], beta_ref[1]], axis=1)

    # Block form: user rows live in columns 0:D, item rows in columns D:2D.
    x_big = jnp.concatenate([rep_all * row_is_user,
                             rep_all * (1.0 - row_is_user)], axis=1)  # (2B, 2D)
    col_is_first = (lax.broadcasted_iota(jnp.int32, (1, 2 * D), 1) < D).astype(f32)
    vmask = row_is_user * col_is_first + (1.0 - row_is_user) * (1.0 - col_is_first)

    h = jnp.dot(x_big, w1_big, preferred_element_type=f32) + b1_big   # (2B, 2D)
    # Per-branch batch statistics (each column has exactly B valid rows).
    mu = jnp.sum(h * vmask, axis=0, keepdims=True) / B
    xc = h - mu
    var = jnp.sum(xc * xc * vmask, axis=0, keepdims=True) / B
    h = xc * lax.rsqrt(var + BN_EPS) * g_big + be_big
    h = jnp.maximum(h, 0.0)
    y_big = jnp.dot(h, w2_big, preferred_element_type=f32) + b2_big   # (2B, 2D)

    # Compact back to (2B, D) and L2-normalize per row (F.normalize, p=2).
    y_all = y_big[:, 0:D] * row_is_user + y_big[:, D:2 * D] * (1.0 - row_is_user)
    inv_norm = lax.rsqrt(jnp.maximum(
        jnp.sum(y_all * y_all, axis=1, keepdims=True), NORM_EPS * NORM_EPS))
    proj_all = y_all * inv_norm                                       # (2B, D)

    # ---- contrastive similarity (1/T folded into q) ------------------------
    qs = proj_all * inv_t
    kpos = jnp.concatenate([proj_all[B:], proj_all[:B]], axis=0)      # swap halves
    pos = jnp.sum(qs * kpos, axis=1, keepdims=True)                   # (2B, 1)

    q_big = jnp.concatenate([qs * row_is_user,
                             qs * (1.0 - row_is_user)], axis=1)       # (2B, 2D)
    kneg_vert = jnp.concatenate([iq_t_ref[...], uq_t_ref[...]], axis=0)  # (2D, K)
    neg = jnp.dot(q_big, kneg_vert, preferred_element_type=f32)       # (2B, K)

    # ---- lane-dense packed outputs ------------------------------------------
    pad = jnp.zeros((B2, SLAB_W - 2 * D - 1), f32)
    slab_ref[...] = jnp.concatenate([rep_all, proj_all, pos, pad], axis=1)
    neg_ref[...] = neg


def felrec_fused_apply(idx_all, mask_all, item_table, user_table, tokens,
                       enc_w, enc_b, proj, item_queue_t, user_queue_t,
                       temperature):
    """Single pallas_call computing both branches: returns (slab, neg)."""
    B2, L = idx_all.shape
    D = enc_w.shape[0]
    N_i, N_u = item_table.shape[0], user_table.shape[0]
    K = item_queue_t.shape[1]
    kernel = functools.partial(_felrec_fused_kernel, inv_t=1.0 / temperature)

    def full(shape):
        nd = len(shape)
        return pl.BlockSpec(shape, lambda i, nd=nd: (0,) * nd)

    flops = 2 * B2 * ((N_i + N_u) * D        # gather matmul
                      + D * D                # encoder
                      + 2 * (2 * D) * (2 * D)  # mlp w1 + w2
                      + (2 * D) * K)         # negatives
    bytes_accessed = 4 * ((N_i + N_u) * D + 2 * D * K + 8 * D * D
                          + B2 * (2 * L + SLAB_W + K) + 8 * D)
    cost = pl.CostEstimate(flops=int(flops),
                           transcendentals=int(B2 * D + 3 * B2),
                           bytes_accessed=int(bytes_accessed))

    slab, neg = pl.pallas_call(
        kernel,
        grid=(1,),
        in_specs=[
            full((B2, L)),            # stacked prev indices (item ids | user ids + N_i)
            full((B2, L)),            # stacked masks
            full((N_i, D)),           # item embedding table
            full((N_u, D)),           # user embedding table
            full((2, 1, D)),          # tokens: [item_token, user_token]
            full((D, D)),             # enc_w (shared encoder)
            full((1, D)),             # enc_b
            full((2, D, D)),          # w1   (0=user_projection, 1=item_projection)
            full((2, 1, D)),          # b1
            full((2, 1, D)),          # gamma
            full((2, 1, D)),          # beta
            full((2, D, D)),          # w2
            full((2, 1, D)),          # b2
            full((D, K)),             # item_queue^T (user-branch negatives)
            full((D, K)),             # user_queue^T (item-branch negatives)
        ],
        out_specs=[
            full((B2, SLAB_W)),       # packed [rep | proj | pos | pad]
            full((B2, K)),            # negative logits
        ],
        out_shape=(
            jax.ShapeDtypeStruct((B2, SLAB_W), jnp.float32),
            jax.ShapeDtypeStruct((B2, K), jnp.float32),
        ),
        compiler_params=pltpu.CompilerParams(
            dimension_semantics=("arbitrary",)),
        cost_estimate=cost,
    )(idx_all, mask_all, item_table, user_table, tokens, enc_w, enc_b,
      proj['w1'], proj['b1'], proj['gamma'], proj['beta'],
      proj['w2'], proj['b2'], item_queue_t, user_queue_t)
    return slab, neg


# ----------------------- parameters / buffers (deterministic) ---------------
def _linear_init(key, din, dout):
    kw, kb = jax.random.split(key)
    bound = 1.0 / (din ** 0.5)
    w = jax.random.uniform(kw, (din, dout), jnp.float32, -bound, bound)
    b = jax.random.uniform(kb, (1, dout), jnp.float32, -bound, bound)
    return w, b


def _mlp_init(key, d):
    k1, k2 = jax.random.split(key)
    w1, b1 = _linear_init(k1, d, d)
    w2, b2 = _linear_init(k2, d, d)
    return {'w1': w1, 'b1': b1,
            'gamma': jnp.ones((1, d), jnp.float32),
            'beta': jnp.zeros((1, d), jnp.float32),
            'w2': w2, 'b2': b2}


def init_params(key):
    keys = jax.random.split(key, 5)
    enc_w, enc_b = _linear_init(keys[0], D_MODEL, D_MODEL)
    user_mlp = _mlp_init(keys[3], D_MODEL)
    item_mlp = _mlp_init(keys[4], D_MODEL)          # share_mlp=False
    proj = {k: jnp.stack([user_mlp[k], item_mlp[k]]) for k in user_mlp}
    user_token = jax.random.normal(keys[1], (1, 1, D_MODEL), jnp.float32)
    item_token = jax.random.normal(keys[2], (1, 1, D_MODEL), jnp.float32)
    return {
        'enc_w': enc_w, 'enc_b': enc_b,
        # tokens stacked once at init: [0]=item_token (user branch), [1]=user_token
        'tokens': jnp.concatenate([item_token, user_token], axis=0),
        'proj': proj,
    }


def init_state(key):
    k1, k2 = jax.random.split(key)
    uq = jax.random.normal(k1, (QUEUE_K, D_MODEL), jnp.float32)
    iq = jax.random.normal(k2, (QUEUE_K, D_MODEL), jnp.float32)
    uq = uq / jnp.maximum(jnp.linalg.norm(uq, axis=1, keepdims=True), NORM_EPS)
    iq = iq / jnp.maximum(jnp.linalg.norm(iq, axis=1, keepdims=True), NORM_EPS)
    return {
        'user_embeddings': jnp.zeros((NUM_USERS, D_MODEL), jnp.float32),
        'item_embeddings': jnp.zeros((NUM_ITEMS, D_MODEL), jnp.float32),
        # Queues kept transposed (D, K) as the canonical layout so the kernel
        # consumes them directly (no per-step wrapper transpose).
        'user_queue_t': uq.T,
        'item_queue_t': iq.T,
        'queue_ptr': jnp.zeros((1,), jnp.int32),
    }


# ------------------------------ forward pass --------------------------------
def felrec_q_forward(params, state, user_data, item_data, training=True):
    user, prev_items, prev_items_mask = user_data
    item, prev_users, prev_users_mask = item_data
    B = prev_items.shape[0]
    n_items = state['item_embeddings'].shape[0]

    # Stacked layout: rows 0:B = user branch, rows B:2B = item branch.
    # Item-branch indices are offset into the concatenated [item; user] table.
    idx_all = jnp.concatenate(
        [prev_items.astype(jnp.int32),
         prev_users.astype(jnp.int32) + n_items], axis=0)          # (2B, L)
    mask_all = jnp.concatenate(
        [prev_items_mask, prev_users_mask], axis=0).astype(jnp.float32)

    slab, neg = felrec_fused_apply(
        idx_all, mask_all,
        state['item_embeddings'], state['user_embeddings'],
        params['tokens'], params['enc_w'], params['enc_b'], params['proj'],
        state['item_queue_t'], state['user_queue_t'], TEMP)

    D = D_MODEL
    rep_all = slab[:, :D]
    proj_all = slab[:, D:2 * D]
    pos = slab[:, 2 * D:2 * D + 1]

    user_rep, item_rep = rep_all[:B], rep_all[B:]

    # buffer writes: self.user_embeddings[user] = rep.detach() (functional)
    new_state = dict(state)
    new_state['user_embeddings'] = state['user_embeddings'].at[user].set(
        jax.lax.stop_gradient(user_rep))
    new_state['item_embeddings'] = state['item_embeddings'].at[item].set(
        jax.lax.stop_gradient(item_rep))

    if not training:
        return (user_rep, item_rep), new_state

    user_proj, item_proj = proj_all[:B], proj_all[B:]
    logits = jnp.concatenate([pos, neg], axis=-1)                  # (2B, 1+K)
    user_logits, item_logits = logits[:B], logits[B:]
    targets = jnp.zeros((B,), dtype=jnp.int32)                     # torch.long -> int32

    # update_queues (functional; queues used above are pre-update clones)
    assert QUEUE_K % B == 0
    ptr = state['queue_ptr'][0]
    new_state['user_queue_t'] = jax.lax.dynamic_update_slice(
        state['user_queue_t'], jax.lax.stop_gradient(user_proj).T, (0, ptr))
    new_state['item_queue_t'] = jax.lax.dynamic_update_slice(
        state['item_queue_t'], jax.lax.stop_gradient(item_proj).T, (0, ptr))
    new_state['queue_ptr'] = jnp.mod(ptr + B, QUEUE_K).astype(jnp.int32).reshape(1)

    user_outputs = (user_logits, targets, user_rep)
    item_outputs = (item_logits, targets, item_rep)
    return (user_outputs, item_outputs), new_state


# ---------------------------------- main -------------------------------------
if __name__ == "__main__":
    key = jax.random.PRNGKey(0)
    pkey, skey, dkey = jax.random.split(key, 3)

    params = init_params(pkey)
    state = init_state(skey)

    k1, k2, k3, k4 = jax.random.split(dkey, 4)
    user = jnp.arange(BATCH, dtype=jnp.int32)
    item = jnp.arange(BATCH, dtype=jnp.int32) + BATCH
    prev_items = jax.random.randint(k1, (BATCH, SEQ_LEN), 0, NUM_ITEMS, jnp.int32)
    prev_users = jax.random.randint(k2, (BATCH, SEQ_LEN), 0, NUM_USERS, jnp.int32)
    prev_items_mask = (jax.random.uniform(k3, (BATCH, SEQ_LEN)) > 0.3).astype(jnp.float32)
    prev_users_mask = (jax.random.uniform(k4, (BATCH, SEQ_LEN)) > 0.3).astype(jnp.float32)

    (user_out, item_out), new_state = felrec_q_forward(
        params, state,
        (user, prev_items, prev_items_mask),
        (item, prev_users, prev_users_mask),
        training=True)

    jax.block_until_ready((user_out, item_out, new_state))

    u_logits, u_targets, u_rep = user_out
    i_logits, i_targets, i_rep = item_out
    assert u_logits.shape == (BATCH, 1 + QUEUE_K)
    assert i_logits.shape == (BATCH, 1 + QUEUE_K)
    assert u_rep.shape == (BATCH, D_MODEL)
    assert i_rep.shape == (BATCH, D_MODEL)
    assert u_targets.shape == (BATCH,)
    assert i_targets.shape == (BATCH,)
    assert new_state['user_queue_t'].shape == (D_MODEL, QUEUE_K)
    assert int(new_state['queue_ptr'][0]) == BATCH % QUEUE_K

    print("KERNEL_OK")
</pallas_src>

<mosaic_0001>
module attributes {stable_mosaic.version = 11 : i64} {
  func.func @_felrec_fused_kernel(%arg0: i32, %arg1: memref<16x8xi32, #tpu.memory_space<vmem>>, %arg2: memref<16x8xf32, #tpu.memory_space<vmem>>, %arg3: memref<64x32xf32, #tpu.memory_space<vmem>>, %arg4: memref<64x32xf32, #tpu.memory_space<vmem>>, %arg5: memref<2x1x32xf32, #tpu.memory_space<vmem>>, %arg6: memref<32x32xf32, #tpu.memory_space<vmem>>, %arg7: memref<1x32xf32, #tpu.memory_space<vmem>>, %arg8: memref<2x32x32xf32, #tpu.memory_space<vmem>>, %arg9: memref<2x1x32xf32, #tpu.memory_space<vmem>>, %arg10: memref<2x1x32xf32, #tpu.memory_space<vmem>>, %arg11: memref<2x1x32xf32, #tpu.memory_space<vmem>>, %arg12: memref<2x32x32xf32, #tpu.memory_space<vmem>>, %arg13: memref<2x1x32xf32, #tpu.memory_space<vmem>>, %arg14: memref<32x128xf32, #tpu.memory_space<vmem>>, %arg15: memref<32x128xf32, #tpu.memory_space<vmem>>, %arg16: memref<16x128xf32, #tpu.memory_space<vmem>>, %arg17: memref<16x128xf32, #tpu.memory_space<vmem>>) attributes {dimension_semantics = [#tpu.dimension_semantics<arbitrary>], iteration_bounds = array<i64: 1>, scalar_prefetch = 0 : i64, scratch_operands = 0 : i64, tpu.core_type = #tpu.core_type<tc>, window_params = [{pipeline_mode = #tpu.pipeline_mode<synchronous>, transform_indices = @transform_0, window_bounds = array<i64: 16, 8>}, {pipeline_mode = #tpu.pipeline_mode<synchronous>, transform_indices = @transform_1, window_bounds = array<i64: 16, 8>}, {pipeline_mode = #tpu.pipeline_mode<synchronous>, transform_indices = @transform_2, window_bounds = array<i64: 64, 32>}, {pipeline_mode = #tpu.pipeline_mode<synchronous>, transform_indices = @transform_3, window_bounds = array<i64: 64, 32>}, {pipeline_mode = #tpu.pipeline_mode<synchronous>, transform_indices = @transform_4, window_bounds = array<i64: 2, 1, 32>}, {pipeline_mode = #tpu.pipeline_mode<synchronous>, transform_indices = @transform_5, window_bounds = array<i64: 32, 32>}, {pipeline_mode = #tpu.pipeline_mode<synchronous>, transform_indices = @transform_6, window_bounds = array<i64: 1, 32>}, {pipeline_mode = #tpu.pipeline_mode<synchronous>, transform_indices = @transform_7, window_bounds = array<i64: 2, 32, 32>}, {pipeline_mode = #tpu.pipeline_mode<synchronous>, transform_indices = @transform_8, window_bounds = array<i64: 2, 1, 32>}, {pipeline_mode = #tpu.pipeline_mode<synchronous>, transform_indices = @transform_9, window_bounds = array<i64: 2, 1, 32>}, {pipeline_mode = #tpu.pipeline_mode<synchronous>, transform_indices = @transform_10, window_bounds = array<i64: 2, 1, 32>}, {pipeline_mode = #tpu.pipeline_mode<synchronous>, transform_indices = @transform_11, window_bounds = array<i64: 2, 32, 32>}, {pipeline_mode = #tpu.pipeline_mode<synchronous>, transform_indices = @transform_12, window_bounds = array<i64: 2, 1, 32>}, {pipeline_mode = #tpu.pipeline_mode<synchronous>, transform_indices = @transform_13, window_bounds = array<i64: 32, 128>}, {pipeline_mode = #tpu.pipeline_mode<synchronous>, transform_indices = @transform_14, window_bounds = array<i64: 32, 128>}, {pipeline_mode = #tpu.pipeline_mode<synchronous>, transform_indices = @transform_15, window_bounds = array<i64: 16, 128>}, {pipeline_mode = #tpu.pipeline_mode<synchronous>, transform_indices = @transform_16, window_bounds = array<i64: 16, 128>}]} {
    %0 = tpu.iota {dimensions = array<i32: 0>} : vector<16x1xi32>
    %c8_i32 = arith.constant 8 : i32
    %1 = vector.broadcast %c8_i32 : i32 to vector<16x1xi32>
    %2 = arith.cmpi slt, %0, %1 : vector<16x1xi32>
    %3 = arith.extui %2 : vector<16x1xi1> to vector<16x1xi32>
    %4 = arith.sitofp %3 : vector<16x1xi32> to vector<16x1xf32>
    %c0 = arith.constant 0 : index
    %c0_0 = arith.constant 0 : index
    %5 = vector.load %arg2[%c0, %c0_0] : memref<16x8xf32, #tpu.memory_space<vmem>>, vector<16x8xf32>
    %cst = arith.constant dense<0.000000e+00> : vector<16xf32>
    %6 = vector.multi_reduction <add>, %5, %cst [1] : vector<16x8xf32> to vector<16xf32>
    %7 = vector.shape_cast %6 : vector<16xf32> to vector<16x1xf32>
    %cst_1 = arith.constant 1.000000e+00 : f32
    %8 = vector.broadcast %cst_1 : f32 to vector<16x1xf32>
    %9 = arith.maximumf %7, %8 : vector<16x1xf32>
    %10 = vector.broadcast %9 : vector<16x1xf32> to vector<16x8xf32>
    %11 = arith.divf %5, %10 : vector<16x8xf32>
    %c0_2 = arith.constant 0 : index
    %c0_3 = arith.constant 0 : index
    %12 = vector.load %arg3[%c0_2, %c0_3] : memref<64x32xf32, #tpu.memory_space<vmem>>, vector<64x32xf32>
    %c0_4 = arith.constant 0 : index
    %c0_5 = arith.constant 0 : index
    %13 = vector.load %arg4[%c0_4, %c0_5] : memref<64x32xf32, #tpu.memory_space<vmem>>, vector<64x32xf32>
    %14 = tpu.concatenate %12, %13 in 0 : vector<64x32xf32>, vector<64x32xf32> -> vector<128x32xf32>
    %15 = tpu.iota {dimensions = array<i32: 2>} : vector<16x8x128xi32>
    %c0_6 = arith.constant 0 : index
    %c0_7 = arith.constant 0 : index
    %16 = vector.load %arg1[%c0_6, %c0_7] : memref<16x8xi32, #tpu.memory_space<vmem>>, vector<16x8xi32>
    %17 = vector.shape_cast %16 : vector<16x8xi32> to vector<16x8x1xi32>
    %18 = vector.broadcast %17 : vector<16x8x1xi32> to vector<16x8x128xi32>
    %19 = arith.cmpi eq, %18, %15 : vector<16x8x128xi32>
    %20 = vector.shape_cast %11 : vector<16x8xf32> to vector<16x8x1xf32>
    %cst_8 = arith.constant 0.000000e+00 : f32
    %21 = vector.shape_cast %20 : vector<16x8x1xf32> to vector<16x8x1xf32>
    %22 = vector.broadcast %21 : vector<16x8x1xf32> to vector<16x8x128xf32>
    %23 = vector.broadcast %cst_8 : f32 to vector<16x8x128xf32>
    %24 = arith.select %19, %22, %23 : vector<16x8x128xi1>, vector<16x8x128xf32>
    %cst_9 = arith.constant dense<0.000000e+00> : vector<16x128xf32>
    %25 = vector.multi_reduction <add>, %24, %cst_9 [1] : vector<16x8x128xf32> to vector<16x128xf32>
    %cst_10 = arith.constant dense<0.000000e+00> : vector<16x32xf32>
    %26 = tpu.matmul %25, %14, %cst_10 {dimension_numbers = #tpu.dot_dimension_numbers<[1], [0], [0], [1], [0, 0, 1, 1], [], []>} : vector<16x128xf32>, vector<128x32xf32>, vector<16x32xf32> -> vector<16x32xf32>
    %cst_11 = arith.constant dense<0.000000e+00> : vector<16xf32>
    %27 = vector.multi_reduction <add>, %11, %cst_11 [1] : vector<16x8xf32> to vector<16xf32>
    %28 = vector.shape_cast %27 : vector<16xf32> to vector<16x1xf32>
    %c0_12 = arith.constant 0 : index
    %c0_13 = arith.constant 0 : index
    %c0_14 = arith.constant 0 : index
    %29 = vector.load %arg5[%c0_12, %c0_13, %c0_14] : memref<2x1x32xf32, #tpu.memory_space<vmem>>, vector<1x1x32xf32>
    %30 = vector.shape_cast %29 : vector<1x1x32xf32> to vector<1x32xf32>
    %31 = vector.broadcast %4 : vector<16x1xf32> to vector<16x32xf32>
    %32 = vector.broadcast %30 : vector<1x32xf32> to vector<16x32xf32>
    %33 = arith.mulf %31, %32 : vector<16x32xf32>
    %cst_15 = arith.constant 1.000000e+00 : f32
    %34 = vector.broadcast %cst_15 : f32 to vector<16x1xf32>
    %35 = arith.subf %34, %4 : vector<16x1xf32>
    %c1 = arith.constant 1 : index
    %c0_16 = arith.constant 0 : index
    %c0_17 = arith.constant 0 : index
    %36 = vector.load %arg5[%c1, %c0_16, %c0_17] : memref<2x1x32xf32, #tpu.memory_space<vmem>>, vector<1x1x32xf32>
    %37 = vector.shape_cast %36 : vector<1x1x32xf32> to vector<1x32xf32>
    %38 = vector.broadcast %35 : vector<16x1xf32> to vector<16x32xf32>
    %39 = vector.broadcast %37 : vector<1x32xf32> to vector<16x32xf32>
    %40 = arith.mulf %38, %39 : vector<16x32xf32>
    %41 = arith.addf %33, %40 : vector<16x32xf32>
    %42 = vector.broadcast %28 : vector<16x1xf32> to vector<16x32xf32>
    %43 = arith.mulf %42, %41 : vector<16x32xf32>
    %44 = arith.addf %26, %43 : vector<16x32xf32>
    %c0_18 = arith.constant 0 : index
    %c0_19 = arith.constant 0 : index
    %45 = vector.load %arg6[%c0_18, %c0_19] : memref<32x32xf32, #tpu.memory_space<vmem>>, vector<32x32xf32>
    %cst_20 = arith.constant dense<0.000000e+00> : vector<16x32xf32>
    %46 = tpu.matmul %44, %45, %cst_20 {dimension_numbers = #tpu.dot_dimension_numbers<[1], [0], [0], [1], [0, 0, 1, 1], [], []>} : vector<16x32xf32>, vector<32x32xf32>, vector<16x32xf32> -> vector<16x32xf32>
    %c0_21 = arith.constant 0 : index
    %c0_22 = arith.constant 0 : index
    %47 = vector.load %arg7[%c0_21, %c0_22] : memref<1x32xf32, #tpu.memory_space<vmem>>, vector<1x32xf32>
    %48 = vector.broadcast %47 : vector<1x32xf32> to vector<16x32xf32>
    %49 = arith.addf %46, %48 : vector<16x32xf32>
    %50 = math.tanh %49 : vector<16x32xf32>
    %cst_23 = arith.constant 0.000000e+00 : f32
    %51 = vector.broadcast %cst_23 : f32 to vector<32x32xf32>
    %c0_24 = arith.constant 0 : index
    %c0_25 = arith.constant 0 : index
    %c0_26 = arith.constant 0 : index
    %52 = vector.load %arg8[%c0_24, %c0_25, %c0_26] : memref<2x32x32xf32, #tpu.memory_space<vmem>>, vector<1x32x32xf32>
    %53 = vector.shape_cast %52 : vector<1x32x32xf32> to vector<32x32xf32>
    %54 = tpu.concatenate %53, %51 in 1 : vector<32x32xf32>, vector<32x32xf32> -> vector<32x64xf32>
    %c1_27 = arith.constant 1 : index
    %c0_28 = arith.constant 0 : index
    %c0_29 = arith.constant 0 : index
    %55 = vector.load %arg8[%c1_27, %c0_28, %c0_29] : memref<2x32x32xf32, #tpu.memory_space<vmem>>, vector<1x32x32xf32>
    %56 = vector.shape_cast %55 : vector<1x32x32xf32> to vector<32x32xf32>
    %57 = tpu.concatenate %51, %56 in 1 : vector<32x32xf32>, vector<32x32xf32> -> vector<32x64xf32>
    %58 = tpu.concatenate %54, %57 in 0 : vector<32x64xf32>, vector<32x64xf32> -> vector<64x64xf32>
    %c0_30 = arith.constant 0 : index
    %c0_31 = arith.constant 0 : index
    %c0_32 = arith.constant 0 : index
    %59 = vector.load %arg12[%c0_30, %c0_31, %c0_32] : memref<2x32x32xf32, #tpu.memory_space<vmem>>, vector<1x32x32xf32>
    %60 = vector.shape_cast %59 : vector<1x32x32xf32> to vector<32x32xf32>
    %61 = tpu.concatenate %60, %51 in 1 : vector<32x32xf32>, vector<32x32xf32> -> vector<32x64xf32>
    %c1_33 = arith.constant 1 : index
    %c0_34 = arith.constant 0 : index
    %c0_35 = arith.constant 0 : index
    %62 = vector.load %arg12[%c1_33, %c0_34, %c0_35] : memref<2x32x32xf32, #tpu.memory_space<vmem>>, vector<1x32x32xf32>
    %63 = vector.shape_cast %62 : vector<1x32x32xf32> to vector<32x32xf32>
    %64 = tpu.concatenate %51, %63 in 1 : vector<32x32xf32>, vector<32x32xf32> -> vector<32x64xf32>
    %65 = tpu.concatenate %61, %64 in 0 : vector<32x64xf32>, vector<32x64xf32> -> vector<64x64xf32>
    %c0_36 = arith.constant 0 : index
    %c0_37 = arith.constant 0 : index
    %c0_38 = arith.constant 0 : index
    %66 = vector.load %arg9[%c0_36, %c0_37, %c0_38] : memref<2x1x32xf32, #tpu.memory_space<vmem>>, vector<1x1x32xf32>
    %67 = vector.shape_cast %66 : vector<1x1x32xf32> to vector<1x32xf32>
    %c1_39 = arith.constant 1 : index
    %c0_40 = arith.constant 0 : index
    %c0_41 = arith.constant 0 : index
    %68 = vector.load %arg9[%c1_39, %c0_40, %c0_41] : memref<2x1x32xf32, #tpu.memory_space<vmem>>, vector<1x1x32xf32>
    %69 = vector.shape_cast %68 : vector<1x1x32xf32> to vector<1x32xf32>
    %70 = tpu.concatenate %67, %69 in 1 : vector<1x32xf32>, vector<1x32xf32> -> vector<1x64xf32>
    %c0_42 = arith.constant 0 : index
    %c0_43 = arith.constant 0 : index
    %c0_44 = arith.constant 0 : index
    %71 = vector.load %arg13[%c0_42, %c0_43, %c0_44] : memref<2x1x32xf32, #tpu.memory_space<vmem>>, vector<1x1x32xf32>
    %72 = vector.shape_cast %71 : vector<1x1x32xf32> to vector<1x32xf32>
    %c1_45 = arith.constant 1 : index
    %c0_46 = arith.constant 0 : index
    %c0_47 = arith.constant 0 : index
    %73 = vector.load %arg13[%c1_45, %c0_46, %c0_47] : memref<2x1x32xf32, #tpu.memory_space<vmem>>, vector<1x1x32xf32>
    %74 = vector.shape_cast %73 : vector<1x1x32xf32> to vector<1x32xf32>
    %75 = tpu.concatenate %72, %74 in 1 : vector<1x32xf32>, vector<1x32xf32> -> vector<1x64xf32>
    %c0_48 = arith.constant 0 : index
    %c0_49 = arith.constant 0 : index
    %c0_50 = arith.constant 0 : index
    %76 = vector.load %arg10[%c0_48, %c0_49, %c0_50] : memref<2x1x32xf32, #tpu.memory_space<vmem>>, vector<1x1x32xf32>
    %77 = vector.shape_cast %76 : vector<1x1x32xf32> to vector<1x32xf32>
    %c1_51 = arith.constant 1 : index
    %c0_52 = arith.constant 0 : index
    %c0_53 = arith.constant 0 : index
    %78 = vector.load %arg10[%c1_51, %c0_52, %c0_53] : memref<2x1x32xf32, #tpu.memory_space<vmem>>, vector<1x1x32xf32>
    %79 = vector.shape_cast %78 : vector<1x1x32xf32> to vector<1x32xf32>
    %80 = tpu.concatenate %77, %79 in 1 : vector<1x32xf32>, vector<1x32xf32> -> vector<1x64xf32>
    %c0_54 = arith.constant 0 : index
    %c0_55 = arith.constant 0 : index
    %c0_56 = arith.constant 0 : index
    %81 = vector.load %arg11[%c0_54, %c0_55, %c0_56] : memref<2x1x32xf32, #tpu.memory_space<vmem>>, vector<1x1x32xf32>
    %82 = vector.shape_cast %81 : vector<1x1x32xf32> to vector<1x32xf32>
    %c1_57 = arith.constant 1 : index
    %c0_58 = arith.constant 0 : index
    %c0_59 = arith.constant 0 : index
    %83 = vector.load %arg11[%c1_57, %c0_58, %c0_59] : memref<2x1x32xf32, #tpu.memory_space<vmem>>, vector<1x1x32xf32>
    %84 = vector.shape_cast %83 : vector<1x1x32xf32> to vector<1x32xf32>
    %85 = tpu.concatenate %82, %84 in 1 : vector<1x32xf32>, vector<1x32xf32> -> vector<1x64xf32>
    %86 = vector.broadcast %4 : vector<16x1xf32> to vector<16x32xf32>
    %87 = arith.mulf %50, %86 : vector<16x32xf32>
    %cst_60 = arith.constant 1.000000e+00 : f32
    %88 = vector.broadcast %cst_60 : f32 to vector<16x1xf32>
    %89 = arith.subf %88, %4 : vector<16x1xf32>
    %90 = vector.broadcast %89 : vector<16x1xf32> to vector<16x32xf32>
    %91 = arith.mulf %50, %90 : vector<16x32xf32>
    %92 = tpu.concatenate %87, %91 in 1 : vector<16x32xf32>, vector<16x32xf32> -> vector<16x64xf32>
    %93 = tpu.iota {dimensions = array<i32: 1>} : vector<1x64xi32>
    %c32_i32 = arith.constant 32 : i32
    %94 = vector.broadcast %c32_i32 : i32 to vector<1x64xi32>
    %95 = arith.cmpi slt, %93, %94 : vector<1x64xi32>
    %96 = arith.extui %95 : vector<1x64xi1> to vector<1x64xi32>
    %97 = arith.sitofp %96 : vector<1x64xi32> to vector<1x64xf32>
    %98 = vector.broadcast %4 : vector<16x1xf32> to vector<16x64xf32>
    %99 = vector.broadcast %97 : vector<1x64xf32> to vector<16x64xf32>
    %100 = arith.mulf %98, %99 : vector<16x64xf32>
    %cst_61 = arith.constant 1.000000e+00 : f32
    %101 = vector.broadcast %cst_61 : f32 to vector<16x1xf32>
    %102 = arith.subf %101, %4 : vector<16x1xf32>
    %cst_62 = arith.constant 1.000000e+00 : f32
    %103 = vector.broadcast %cst_62 : f32 to vector<1x64xf32>
    %104 = arith.subf %103, %97 : vector<1x64xf32>
    %105 = vector.broadcast %102 : vector<16x1xf32> to vector<16x64xf32>
    %106 = vector.broadcast %104 : vector<1x64xf32> to vector<16x64xf32>
    %107 = arith.mulf %105, %106 : vector<16x64xf32>
    %108 = arith.addf %100, %107 : vector<16x64xf32>
    %cst_63 = arith.constant dense<0.000000e+00> : vector<16x64xf32>
    %109 = tpu.matmul %92, %58, %cst_63 {dimension_numbers = #tpu.dot_dimension_numbers<[1], [0], [0], [1], [0, 0, 1, 1], [], []>} : vector<16x64xf32>, vector<64x64xf32>, vector<16x64xf32> -> vector<16x64xf32>
    %110 = vector.broadcast %70 : vector<1x64xf32> to vector<16x64xf32>
    %111 = arith.addf %109, %110 : vector<16x64xf32>
    %112 = arith.mulf %111, %108 : vector<16x64xf32>
    %cst_64 = arith.constant dense<0.000000e+00> : vector<64xf32>
    %113 = vector.multi_reduction <add>, %112, %cst_64 [0] : vector<16x64xf32> to vector<64xf32>
    %114 = vector.shape_cast %113 : vector<64xf32> to vector<1x64xf32>
    %cst_65 = arith.constant 8.000000e+00 : f32
    %115 = vector.broadcast %cst_65 : f32 to vector<1x64xf32>
    %116 = arith.divf %114, %115 : vector<1x64xf32>
    %117 = vector.broadcast %116 : vector<1x64xf32> to vector<16x64xf32>
    %118 = arith.subf %111, %117 : vector<16x64xf32>
    %119 = arith.mulf %118, %118 : vector<16x64xf32>
    %120 = arith.mulf %119, %108 : vector<16x64xf32>
    %cst_66 = arith.constant dense<0.000000e+00> : vector<64xf32>
    %121 = vector.multi_reduction <add>, %120, %cst_66 [0] : vector<16x64xf32> to vector<64xf32>
    %122 = vector.shape_cast %121 : vector<64xf32> to vector<1x64xf32>
    %cst_67 = arith.constant 8.000000e+00 : f32
    %123 = vector.broadcast %cst_67 : f32 to vector<1x64xf32>
    %124 = arith.divf %122, %123 : vector<1x64xf32>
    %cst_68 = arith.constant 9.99999974E-6 : f32
    %125 = vector.broadcast %cst_68 : f32 to vector<1x64xf32>
    %126 = arith.addf %124, %125 : vector<1x64xf32>
    %127 = math.rsqrt %126 : vector<1x64xf32>
    %128 = vector.broadcast %127 : vector<1x64xf32> to vector<16x64xf32>
    %129 = arith.mulf %118, %128 : vector<16x64xf32>
    %130 = vector.broadcast %80 : vector<1x64xf32> to vector<16x64xf32>
    %131 = arith.mulf %129, %130 : vector<16x64xf32>
    %132 = vector.broadcast %85 : vector<1x64xf32> to vector<16x64xf32>
    %133 = arith.addf %131, %132 : vector<16x64xf32>
    %cst_69 = arith.constant 0.000000e+00 : f32
    %134 = vector.broadcast %cst_69 : f32 to vector<16x64xf32>
    %135 = arith.maximumf %133, %134 : vector<16x64xf32>
    %cst_70 = arith.constant dense<0.000000e+00> : vector<16x64xf32>
    %136 = tpu.matmul %135, %65, %cst_70 {dimension_numbers = #tpu.dot_dimension_numbers<[1], [0], [0], [1], [0, 0, 1, 1], [], []>} : vector<16x64xf32>, vector<64x64xf32>, vector<16x64xf32> -> vector<16x64xf32>
    %137 = vector.broadcast %75 : vector<1x64xf32> to vector<16x64xf32>
    %138 = arith.addf %136, %137 : vector<16x64xf32>
    %139 = vector.extract_strided_slice %138 {offsets = [0, 0], sizes = [16, 32], strides = [1, 1]} : vector<16x64xf32> to vector<16x32xf32>
    %140 = vector.broadcast %4 : vector<16x1xf32> to vector<16x32xf32>
    %141 = arith.mulf %139, %140 : vector<16x32xf32>
    %142 = vector.extract_strided_slice %138 {offsets = [0, 32], sizes = [16, 32], strides = [1, 1]} : vector<16x64xf32> to vector<16x32xf32>
    %cst_71 = arith.constant 1.000000e+00 : f32
    %143 = vector.broadcast %cst_71 : f32 to vector<16x1xf32>
    %144 = arith.subf %143, %4 : vector<16x1xf32>
    %145 = vector.broadcast %144 : vector<16x1xf32> to vector<16x32xf32>
    %146 = arith.mulf %142, %145 : vector<16x32xf32>
    %147 = arith.addf %141, %146 : vector<16x32xf32>
    %148 = arith.mulf %147, %147 : vector<16x32xf32>
    %cst_72 = arith.constant dense<0.000000e+00> : vector<16xf32>
    %149 = vector.multi_reduction <add>, %148, %cst_72 [1] : vector<16x32xf32> to vector<16xf32>
    %150 = vector.shape_cast %149 : vector<16xf32> to vector<16x1xf32>
    %cst_73 = arith.constant 1.000000e-24 : f32
    %151 = vector.broadcast %cst_73 : f32 to vector<16x1xf32>
    %152 = arith.maximumf %150, %151 : vector<16x1xf32>
    %153 = math.rsqrt %152 : vector<16x1xf32>
    %154 = vector.broadcast %153 : vector<16x1xf32> to vector<16x32xf32>
    %155 = arith.mulf %147, %154 : vector<16x32xf32>
    %cst_74 = arith.constant 14.2857141 : f32
    %156 = vector.broadcast %cst_74 : f32 to vector<16x32xf32>
    %157 = arith.mulf %155, %156 : vector<16x32xf32>
    %158 = vector.extract_strided_slice %155 {offsets = [8, 0], sizes = [8, 32], strides = [1, 1]} : vector<16x32xf32> to vector<8x32xf32>
    %159 = vector.extract_strided_slice %155 {offsets = [0, 0], sizes = [8, 32], strides = [1, 1]} : vector<16x32xf32> to vector<8x32xf32>
    %160 = tpu.concatenate %158, %159 in 0 : vector<8x32xf32>, vector<8x32xf32> -> vector<16x32xf32>
    %161 = arith.mulf %157, %160 : vector<16x32xf32>
    %cst_75 = arith.constant dense<0.000000e+00> : vector<16xf32>
    %162 = vector.multi_reduction <add>, %161, %cst_75 [1] : vector<16x32xf32> to vector<16xf32>
    %163 = vector.shape_cast %162 : vector<16xf32> to vector<16x1xf32>
    %164 = vector.broadcast %4 : vector<16x1xf32> to vector<16x32xf32>
    %165 = arith.mulf %157, %164 : vector<16x32xf32>
    %cst_76 = arith.constant 1.000000e+00 : f32
    %166 = vector.broadcast %cst_76 : f32 to vector<16x1xf32>
    %167 = arith.subf %166, %4 : vector<16x1xf32>
    %168 = vector.broadcast %167 : vector<16x1xf32> to vector<16x32xf32>
    %169 = arith.mulf %157, %168 : vector<16x32xf32>
    %170 = tpu.concatenate %165, %169 in 1 : vector<16x32xf32>, vector<16x32xf32> -> vector<16x64xf32>
    %c0_77 = arith.constant 0 : index
    %c0_78 = arith.constant 0 : index
    %171 = vector.load %arg14[%c0_77, %c0_78] : memref<32x128xf32, #tpu.memory_space<vmem>>, vector<32x128xf32>
    %c0_79 = arith.constant 0 : index
    %c0_80 = arith.constant 0 : index
    %172 = vector.load %arg15[%c0_79, %c0_80] : memref<32x128xf32, #tpu.memory_space<vmem>>, vector<32x128xf32>
    %173 = tpu.concatenate %171, %172 in 0 : vector<32x128xf32>, vector<32x128xf32> -> vector<64x128xf32>
    %cst_81 = arith.constant dense<0.000000e+00> : vector<16x128xf32>
    %174 = tpu.matmul %170, %173, %cst_81 {dimension_numbers = #tpu.dot_dimension_numbers<[1], [0], [0], [1], [0, 0, 1, 1], [], []>} : vector<16x64xf32>, vector<64x128xf32>, vector<16x128xf32> -> vector<16x128xf32>
    %cst_82 = arith.constant 0.000000e+00 : f32
    %175 = vector.broadcast %cst_82 : f32 to vector<16x63xf32>
    %176 = tpu.concatenate %50, %155, %163, %175 in 1 : vector<16x32xf32>, vector<16x32xf32>, vector<16x1xf32>, vector<16x63xf32> -> vector<16x128xf32>
    %c0_83 = arith.constant 0 : index
    %c0_84 = arith.constant 0 : index
    %177 = vector.load %arg16[%c0_83, %c0_84] : memref<16x128xf32, #tpu.memory_space<vmem>>, vector<16x128xf32>
    tpu.vector_store %arg16[%c0_83, %c0_84], %176 {strides = array<i32>} : memref<16x128xf32, #tpu.memory_space<vmem>>, vector<16x128xf32>,
    %c0_85 = arith.constant 0 : index
    %c0_86 = arith.constant 0 : index
    %178 = vector.load %arg17[%c0_85, %c0_86] : memref<16x128xf32, #tpu.memory_space<vmem>>, vector<16x128xf32>
    tpu.vector_store %arg17[%c0_85, %c0_86], %174 {strides = array<i32>} : memref<16x128xf32, #tpu.memory_space<vmem>>, vector<16x128xf32>,
    return
  }
  func.func @transform_0(%arg0: i32) -> (i32, i32) {
    %c0_i32 = arith.constant 0 : i32
    %c0_i32_0 = arith.constant 0 : i32
    %c0_i32_1 = arith.constant 0 : i32
    return %c0_i32, %c0_i32_0 : i32, i32
  }
  func.func @transform_1(%arg0: i32) -> (i32, i32) {
    %c0_i32 = arith.constant 0 : i32
    %c0_i32_0 = arith.constant 0 : i32
    %c0_i32_1 = arith.constant 0 : i32
    return %c0_i32, %c0_i32_0 : i32, i32
  }
  func.func @transform_2(%arg0: i32) -> (i32, i32) {
    %c0_i32 = arith.constant 0 : i32
    %c0_i32_0 = arith.constant 0 : i32
    %c0_i32_1 = arith.constant 0 : i32
    return %c0_i32, %c0_i32_0 : i32, i32
  }
  func.func @transform_3(%arg0: i32) -> (i32, i32) {
    %c0_i32 = arith.constant 0 : i32
    %c0_i32_0 = arith.constant 0 : i32
    %c0_i32_1 = arith.constant 0 : i32
    return %c0_i32, %c0_i32_0 : i32, i32
  }
  func.func @transform_4(%arg0: i32) -> (i32, i32, i32) {
    %c0_i32 = arith.constant 0 : i32
    %c0_i32_0 = arith.constant 0 : i32
    %c0_i32_1 = arith.constant 0 : i32
    %c0_i32_2 = arith.constant 0 : i32
    return %c0_i32, %c0_i32_0, %c0_i32_1 : i32, i32, i32
  }
  func.func @transform_5(%arg0: i32) -> (i32, i32) {
    %c0_i32 = arith.constant 0 : i32
    %c0_i32_0 = arith.constant 0 : i32
    %c0_i32_1 = arith.constant 0 : i32
    return %c0_i32, %c0_i32_0 : i32, i32
  }
  func.func @transform_6(%arg0: i32) -> (i32, i32) {
    %c0_i32 = arith.constant 0 : i32
    %c0_i32_0 = arith.constant 0 : i32
    %c0_i32_1 = arith.constant 0 : i32
    return %c0_i32, %c0_i32_0 : i32, i32
  }
  func.func @transform_7(%arg0: i32) -> (i32, i32, i32) {
    %c0_i32 = arith.constant 0 : i32
    %c0_i32_0 = arith.constant 0 : i32
    %c0_i32_1 = arith.constant 0 : i32
    %c0_i32_2 = arith.constant 0 : i32
    return %c0_i32, %c0_i32_0, %c0_i32_1 : i32, i32, i32
  }
  func.func @transform_8(%arg0: i32) -> (i32, i32, i32) {
    %c0_i32 = arith.constant 0 : i32
    %c0_i32_0 = arith.constant 0 : i32
    %c0_i32_1 = arith.constant 0 : i32
    %c0_i32_2 = arith.constant 0 : i32
    return %c0_i32, %c0_i32_0, %c0_i32_1 : i32, i32, i32
  }
  func.func @transform_9(%arg0: i32) -> (i32, i32, i32) {
    %c0_i32 = arith.constant 0 : i32
    %c0_i32_0 = arith.constant 0 : i32
    %c0_i32_1 = arith.constant 0 : i32
    %c0_i32_2 = arith.constant 0 : i32
    return %c0_i32, %c0_i32_0, %c0_i32_1 : i32, i32, i32
  }
  func.func @transform_10(%arg0: i32) -> (i32, i32, i32) {
    %c0_i32 = arith.constant 0 : i32
    %c0_i32_0 = arith.constant 0 : i32
    %c0_i32_1 = arith.constant 0 : i32
    %c0_i32_2 = arith.constant 0 : i32
    return %c0_i32, %c0_i32_0, %c0_i32_1 : i32, i32, i32
  }
  func.func @transform_11(%arg0: i32) -> (i32, i32, i32) {
    %c0_i32 = arith.constant 0 : i32
    %c0_i32_0 = arith.constant 0 : i32
    %c0_i32_1 = arith.constant 0 : i32
    %c0_i32_2 = arith.constant 0 : i32
    return %c0_i32, %c0_i32_0, %c0_i32_1 : i32, i32, i32
  }
  func.func @transform_12(%arg0: i32) -> (i32, i32, i32) {
    %c0_i32 = arith.constant 0 : i32
    %c0_i32_0 = arith.constant 0 : i32
    %c0_i32_1 = arith.constant 0 : i32
    %c0_i32_2 = arith.constant 0 : i32
    return %c0_i32, %c0_i32_0, %c0_i32_1 : i32, i32, i32
  }
  func.func @transform_13(%arg0: i32) -> (i32, i32) {
    %c0_i32 = arith.constant 0 : i32
    %c0_i32_0 = arith.constant 0 : i32
    %c0_i32_1 = arith.constant 0 : i32
    return %c0_i32, %c0_i32_0 : i32, i32
  }
  func.func @transform_14(%arg0: i32) -> (i32, i32) {
    %c0_i32 = arith.constant 0 : i32
    %c0_i32_0 = arith.constant 0 : i32
    %c0_i32_1 = arith.constant 0 : i32
    return %c0_i32, %c0_i32_0 : i32, i32
  }
  func.func @transform_15(%arg0: i32) -> (i32, i32) {
    %c0_i32 = arith.constant 0 : i32
    %c0_i32_0 = arith.constant 0 : i32
    %c0_i32_1 = arith.constant 0 : i32
    return %c0_i32, %c0_i32_0 : i32, i32
  }
  func.func @transform_16(%arg0: i32) -> (i32, i32) {
    %c0_i32 = arith.constant 0 : i32
    %c0_i32_0 = arith.constant 0 : i32
    %c0_i32_1 = arith.constant 0 : i32
    return %c0_i32, %c0_i32_0 : i32, i32
  }
}

</mosaic_0001>

<bundles_post_ra>
// kernel: tpu_custom_call.1
= control target key start
LH: loop header
LB: loop body
LE: loop exit
PB: predicated region body
PF: predicated region fallthrough
CT: control target
= control target key end

     0   :  { %s1611_s0 = inlined_call_operand.vmem [shape: s32[16,8], index: 0, kind: input, shape index: {}]   ;;  %s1612_s1 = inlined_call_operand.vmem [shape: f32[16,8], index: 1, kind: input, shape index: {}]   ;;  %s1613_s2 = inlined_call_operand.vmem [shape: f32[64,32], index: 2, kind: input, shape index: {}]   ;;  %s1614_s3 = inlined_call_operand.vmem [shape: f32[64,32], index: 3, kind: input, shape index: {}]   ;;  %s1615_s4 = inlined_call_operand.vmem [shape: f32[2,1,32], index: 4, kind: input, shape index: {}]   ;;  %s1616_s5 = inlined_call_operand.vmem [shape: f32[32,32], index: 5, kind: input, shape index: {}]   ;;  %s1617_s6 = inlined_call_operand.vmem [shape: f32[1,32], index: 6, kind: input, shape index: {}]   ;;  %s1618_s7 = inlined_call_operand.vmem [shape: f32[2,32,32], index: 7, kind: input, shape index: {}]   ;;  %s1619_s8 = inlined_call_operand.vmem [shape: f32[2,1,32], index: 8, kind: input, shape index: {}]   ;;  %s1620_s9 = inlined_call_operand.vmem [shape: f32[2,1,32], index: 9, kind: input, shape index: {}]   ;;  %s1621_s10 = inlined_call_operand.vmem [shape: f32[2,1,32], index: 10, kind: input, shape index: {}]   ;;  %s1622_s11 = inlined_call_operand.vmem [shape: f32[2,32,32], index: 11, kind: input, shape index: {}]   ;;  %s1623_s12 = inlined_call_operand.vmem [shape: f32[2,1,32], index: 12, kind: input, shape index: {}]   ;;  %s1624_s13 = inlined_call_operand.vmem [shape: f32[32,128], index: 13, kind: input, shape index: {}]   ;;  %s1625_s14 = inlined_call_operand.vmem [shape: f32[32,128], index: 14, kind: input, shape index: {}]   ;;  %s1626_s15 = inlined_call_operand.hbm [shape: f32[16,128], index: 15, kind: output, shape index: {0}]   ;;  %s1627_s16 = inlined_call_operand.hbm [shape: f32[16,128], index: 16, kind: output, shape index: {1}]  }
   0x1   :  { %1629 = sst [smem:[#allocation8_spill]] %s1611_s0 }
   0x2   :  { %22 = vsyncpa [#allocation3], 0  ;;  %v1236_v0 = vld [vmem:[%s1612_s1] sm:$0xff]  ;;  %vm65_vm0 = vcmask 64512   ;;  %v120_v1 = vlaneseq  ;;  %v1244_v4 = vld [vmem:[%s1612_s1 + $0x8] sm:$0xff]  ;;  %s1630_s27 = sld [smem:[#allocation8_spill]] }
   0x3   :  { %v66_v2 = vsel %vm65_vm0, %v1236_v0, 0.0 }
   0x4   :  { %67 = vadd.xlane.f32.xlu0 %v66_v2  ;;  %v126_v3 = vshrl.u32 %v120_v1, 7 }
   0x6   :  { %1062 = vset.pattern.permute.xlu1 %v126_v3  ;;  %1063 = vset.pattern.permute.xlu2 %v126_v3 }
   0x7   :  { %1064 = vset.pattern.permute.xlu0 %v126_v3 }
   0x8   :  { %v122_v5 = vld [vmem:[%s1630_s27] sm:$0xff] }
   0x9   :  { %23 = vsyncpa [#allocation5], 0  ;;  %v69_v6 = vsel %vm65_vm0, %v1244_v4, 0.0  ;;  %v124_v7 = vperm.slane %v122_v5, 0  ;;  %v131_v8 = vperm.slane %v122_v5, 1  ;;  %v145_v9 = vperm.slane %v122_v5, 3 }
   0xa   :  { %v152_v10 = vperm.slane %v122_v5, 4  ;;  %v159_v11 = vperm.slane %v122_v5, 5  ;;  %v1254_v12 = vld [vmem:[%s1630_s27 + $0x8] sm:$0xff]  ;;  %v138_v13 = vperm.slane %v122_v5, 2  ;;  %v166_v15 = vperm.slane %v122_v5, 6  ;;  %s1140_s25 = smov 32  }
   0xb   :  { %v194_v14 = vperm.slane %v1254_v12, 2  ;;  %v187_v16 = vperm.slane %v1254_v12, 1  ;;  %v173_v17 = vperm.slane %v122_v5, 7  ;;  %v208_v18 = vperm.slane %v1254_v12, 4  ;;  %s978_s23 = sshll.u32 %s1626_s15, 4  ;;  %s1145_s24 = smov 128   ;;  %s979_s23 = int_to_ptr.hbm [resolvable:$true] %s978_s23 }
   0xc   :  { %70 = vadd.xlane.f32.xlu0 %v69_v6  ;;  %v180_v19 = vperm.slane %v1254_v12, 0  ;;  %v215_v20 = vperm.slane %v1254_v12, 5  ;;  %v201_v21 = vperm.slane %v1254_v12, 3  ;;  %v222_v22 = vperm.slane %v1254_v12, 6  ;;  %s1147_s26 = smov [#allocation4]   ;;  %s991_s15 = sshll.u32 %s1627_s16, 4  ;;  %s992_s15 = int_to_ptr.hbm [resolvable:$true] %s991_s15 }
   0xd   :  { %v229_v5 = vperm.slane %v1254_v12, 7 }
   0xe   :  { %129 = vperm.xlu1 %1062, %v124_v7   ;;  %143 = vperm.xlu2 %1063, %v138_v13   ;;  %v119_v13 = vld [vmem:[%s1614_s3 + $0x38] sm:$0xff] }
   0xf   :  { %540 = vmatpush.msra.mxu0 %v119_v13 }
  0x16   :  { %136 = vperm.xlu1 %1062, %v131_v8   ;;  %192 = vperm.xlu2 %1063, %v187_v16   ;;  %v117_v16 = vld [vmem:[%s1614_s3 + $0x28] sm:$0xff] }
  0x1e   :  { %150 = vperm.xlu1 %1062, %v145_v9   ;;  %213 = vperm.xlu2 %1063, %v208_v18   ;;  %v116_v18 = vld [vmem:[%s1614_s3 + $0x20] sm:$0xff] }
  0x20   :  { %199 = vperm.xlu0 %1064, %v194_v14  }
  0x26   :  { %157 = vperm.xlu1 %1062, %v152_v10  }
  0x28   :  { %206 = vperm.xlu0 %1064, %v201_v21  }
  0x2e   :  { %164 = vperm.xlu1 %1062, %v159_v11  }
  0x30   :  { %227 = vperm.xlu0 %1064, %v222_v22  }
  0x36   :  { %171 = vperm.xlu1 %1062, %v166_v15   ;;  %v118_v15 = vld [vmem:[%s1614_s3 + $0x30] sm:$0xff] }
  0x37   :  { %541 = vmatpush.msra.mxu0 %v118_v15 }
  0x39   :  { %542 = vmatpush.msra.mxu0 %v117_v16 }
  0x3b   :  { %543 = vmatpush.msra.mxu0 %v116_v18 }
  0x3e   :  { %178 = vperm.xlu1 %1062, %v173_v17  }
  0x46   :  { %185 = vperm.xlu1 %1062, %v180_v19   ;;  %v115_v19 = vld [vmem:[%s1614_s3 + $0x18] sm:$0xff] }
  0x47   :  { %544 = vmatpush.msra.mxu0 %v115_v19 }
  0x4e   :  { %220 = vperm.xlu1 %1062, %v215_v20   ;;  %v114_v20 = vld [vmem:[%s1614_s3 + $0x10] sm:$0xff] }
  0x4f   :  { %545 = vmatpush.msra.mxu0 %v114_v20 }
  0x68   :  { %v144_v6 = vpop.permute.xlu2 %143 }
  0x70   :  { %v1281_v9 = vpop.permute.xlu2 %192 }
  0x77   :  { %v68_v23 = vpop.xlane.xlu0 %67 }
  0x78   :  { %v72_v24 = vmax.f32 %v68_v23, 1.0  ;;  %v1285_v11 = vpop.permute.xlu2 %213  ;;  %v113_v23 = vld [vmem:[%s1614_s3 + $0x8] sm:$0xff] }
  0x79   :  { %546 = vmatpush.msra.mxu0 %v113_v23 }
  0x7a   :  { %1072 = vrcp.f32 %v72_v24  ;;  %v85_v30 = vand.u32 2147483648, %v72_v24  ;;  %v83_v32 = vand.u32 2147483647, %v72_v24  ;;  %vm79_vm2 = vweird.f32 %v72_v24 }
  0x7c   :  { %v86_v35 = vor.u32 1.1754944e-38, %v85_v30  ;;  %vm84_vm4 = vcmp.eq.f32.partialorder %v83_v32, 8.507059e+37  ;;  %v1331_v30 = vand.u32 127, %v120_v1  ;;  %v106_v1 = vld [vmem:[%s1613_s2 + $0x10] sm:$0xff] }
  0x7e   :  { %vm238_vm10 = vcmp.eq.s32.totalorder %v144_v6, %v1331_v30 }
  0x7f   :  { %v71_v25 = vpop.xlane.xlu0 %70 }
  0x80   :  { %v1073_v26 = vpop.eup %1072  ;;  %v73_v27 = vmax.f32 %v71_v25, 1.0  ;;  %v130_v62 = vpop.permute.xlu1 %129  ;;  %v112_v25 = vld [vmem:[%s1614_s3] sm:$0xff] }
  0x81   :  { %v75_v28 = vmul.f32 %v1073_v26, %v72_v24  ;;  %vm80_vm1 = vweird.f32 %v1073_v26  ;;  %547 = vmatpush.msra.mxu0 %v112_v25  ;;  %vm236_vm9 = vcmp.eq.s32.totalorder %v130_v62, %v1331_v30 }
  0x82   :  { %1074 = vrcp.f32 %v73_v27  ;;  %vm81_vm3 = vmor %vm79_vm2, %vm80_vm1  ;;  %vm94_vm5 = vweird.f32 %v73_v27  ;;  %v100_v39 = vand.u32 2147483648, %v73_v27  ;;  %v98_v42 = vand.u32 2147483647, %v73_v27 }
  0x83   :  { %v76_v29 = vsub.f32 1.0, %v75_v28 }
  0x84   :  { %v101_v46 = vor.u32 1.1754944e-38, %v100_v39  ;;  %vm99_vm8 = vcmp.eq.f32.partialorder %v98_v42, 8.507059e+37  ;;  %v105_v39 = vld [vmem:[%s1613_s2 + $0x8] sm:$0xff] }
  0x85   :  { %v77_v31 = vmul.f32 %v1073_v26, %v76_v29  ;;  %v109_v29 = vld [vmem:[%s1613_s2 + $0x28] sm:$0xff] }
  0x87   :  { %v78_v33 = vadd.f32 %v1073_v26, %v77_v31 }
  0x88   :  { %v1075_v34 = vpop.eup %1074 }
  0x89   :  { %v82_v36 = vsel %vm81_vm3, %v1073_v26, %v78_v33  ;;  %v90_v37 = vmul.f32 %v1075_v34, %v73_v27  ;;  %vm95_vm6 = vweird.f32 %v1075_v34  ;;  %v111_v26 = vld [vmem:[%s1613_s2 + $0x38] sm:$0xff]  ;;  %v110_v27 = vld [vmem:[%s1613_s2 + $0x30] sm:$0xff]  ;;  %vm517_vm3 = vcmask 1041409  }
  0x8a   :  { %v87_v38 = vsel %vm84_vm4, %v86_v35, %v82_v36  ;;  %vm96_vm7 = vmor %vm94_vm5, %vm95_vm6  ;;  %548 = vmatpush.msra.mxu0 %v111_v26  ;;  %v107_v36 = vld [vmem:[%s1613_s2 + $0x18] sm:$0xff]  ;;  %vm519_vm5 = vcmask 1042434   ;;  %vm245_vm6 = vcmp.eq.s32.totalorder %v1281_v9, %v1331_v30 }
  0x8b   :  { %v1264_v40 = vmul.f32 %v87_v38, %v1236_v0  ;;  %v91_v41 = vsub.f32 1.0, %v90_v37  ;;  %v1275_v0 = vpop.permute.xlu1 %136 }
  0x8c   :  { %549 = vmatpush.msra.mxu0 %v110_v27  ;;  %vm237_vm12 = vcmp.eq.s32.totalorder %v1275_v0, %v1331_v30 }
  0x8d   :  { %v92_v43 = vmul.f32 %v1075_v34, %v91_v41  ;;  %v259_v44 = vperm.slane %v1264_v40, 1  ;;  %v252_v45 = vperm.slane %v1264_v40, 0  ;;  %v301_v51 = vperm.slane %v1264_v40, 7 }
  0x8e   :  { %v266_v52 = vperm.slane %v1264_v40, 2  ;;  %v273_v54 = vperm.slane %v1264_v40, 3  ;;  %v280_v57 = vperm.slane %v1264_v40, 4  ;;  %v287_v60 = vperm.slane %v1264_v40, 5  ;;  %550 = vmatpush.msra.mxu0 %v109_v29 }
  0x8f   :  { %v93_v47 = vadd.f32 %v1075_v34, %v92_v43  ;;  %264 = vperm.xlu0 %1064, %v259_v44   ;;  %257 = vperm.xlu2 %1063, %v252_v45   ;;  %v294_v63 = vperm.slane %v1264_v40, 6  ;;  %v476_v28 = vsel %vm65_vm0, %v1264_v40, 0.0  ;;  %v104_v44 = vld [vmem:[%s1613_s2] sm:$0xff] }
  0x91   :  { %v97_v48 = vsel %vm96_vm7, %v1075_v34, %v93_v47  ;;  %v108_v34 = vld [vmem:[%s1613_s2 + $0x20] sm:$0xff] }
  0x92   :  { %v102_v49 = vsel %vm99_vm8, %v101_v46, %v97_v48  ;;  %v1292_v12 = vpop.permute.xlu0 %199  ;;  %551 = vmatpush.msra.mxu0 %v108_v34  ;;  %vm521_vm8 = vcmask 1043459  }
  0x93   :  { %v103_v50 = vmul.f32 %v102_v49, %v1244_v4  ;;  %v151_v4 = vpop.permute.xlu1 %150  ;;  %vm246_vm2 = vcmp.eq.s32.totalorder %v1292_v12, %v1331_v30 }
  0x94   :  { %552 = vmatpush.msra.mxu0 %v107_v36  ;;  %vm239_vm11 = vcmp.eq.s32.totalorder %v151_v4, %v1331_v30 }
  0x95   :  { %v308_v53 = vperm.slane %v103_v50, 0  ;;  %v329_v55 = vperm.slane %v103_v50, 3  ;;  %v322_v56 = vperm.slane %v103_v50, 2  ;;  %v350_v58 = vperm.slane %v103_v50, 6 }
  0x96   :  { %v343_v59 = vperm.slane %v103_v50, 5  ;;  %v357_v61 = vperm.slane %v103_v50, 7  ;;  %v315_v2 = vperm.slane %v103_v50, 1  ;;  %v336_v3 = vperm.slane %v103_v50, 4  ;;  %553 = vmatpush.msra.mxu0 %v106_v1 }
  0x97   :  { %306 = vperm.xlu0 %1064, %v301_v51   ;;  %271 = vperm.xlu2 %1063, %v266_v52   ;;  %v479_v8 = vsel %vm65_vm0, %v103_v50, 0.0 }
  0x98   :  { %313 = vperm.xlu1 %1062, %v308_v53   ;;  %554 = vmatpush.msra.mxu0 %v105_v39 }
  0x9a   :  { %v1311_v22 = vpop.permute.xlu0 %206  ;;  %555 = vmatpush.msra.mxu0 %v104_v44 }
  0x9b   :  { %v1278_v7 = vpop.permute.xlu1 %157  ;;  %vm247_vm4 = vcmp.eq.s32.totalorder %v1311_v22, %v1331_v30 }
  0x9c   :  { %vm240_vm13 = vcmp.eq.s32.totalorder %v1278_v7, %v1331_v30 }
  0x9f   :  { %278 = vperm.xlu2 %1063, %v273_v54   ;;  %334 = vperm.xlu0 %1064, %v329_v55  }
  0xa0   :  { %327 = vperm.xlu1 %1062, %v322_v56  }
  0xa2   :  { %v1333_v32 = vpop.permute.xlu0 %227 }
  0xa3   :  { %v1283_v10 = vpop.permute.xlu1 %164 }
  0xa4   :  { %vm241_vm14 = vcmp.eq.s32.totalorder %v1283_v10, %v1331_v30 }
  0xa7   :  { %285 = vperm.xlu2 %1063, %v280_v57   ;;  %355 = vperm.xlu0 %1064, %v350_v58  }
  0xa8   :  { %348 = vperm.xlu1 %1062, %v343_v59  }
  0xab   :  { %v1290_v14 = vpop.permute.xlu1 %171 }
  0xac   :  { %vm242_vm1 = vcmp.eq.s32.totalorder %v1290_v14, %v1331_v30 }
  0xaf   :  { %292 = vperm.xlu2 %1063, %v287_v60  }
  0xb0   :  { %362 = vperm.xlu1 %1062, %v357_v61  }
  0xb3   :  { %v1309_v21 = vpop.permute.xlu1 %178 }
  0xb4   :  { %vm243_vm15 = vcmp.eq.s32.totalorder %v1309_v21, %v1331_v30 }
  0xb7   :  { %299 = vperm.xlu2 %1063, %v294_v63  }
  0xbb   :  { %v186_v31 = vpop.permute.xlu1 %185 }
  0xbc   :  { %vm244_vm0 = vcmp.eq.s32.totalorder %v186_v31, %v1331_v30 }
  0xbf   :  { %320 = vperm.xlu2 %1063, %v315_v2  }
  0xc3   :  { %v1355_v45 = vpop.permute.xlu1 %220 }
  0xc4   :  { %vm249_vm7 = vcmp.eq.s32.totalorder %v1355_v45, %v1331_v30 }
  0xc7   :  { %341 = vperm.xlu2 %1063, %v336_v3  }
  0xcf   :  { %234 = vperm.xlu2 %1063, %v229_v5  }
  0xd1   :  { %480 = vadd.xlane.f32.xlu0 %v479_v8 }
  0xe9   :  { %v258_v17 = vpop.permute.xlu2 %257 }
  0xea   :  { %v364_v35 = vsel %vm236_vm9, %v258_v17, 0.0  ;;  %vm250_vm9 = vcmp.eq.s32.totalorder %v1333_v32, %v1331_v30 }
  0xeb   :  { %v380_v37 = vrot.slane %v364_v35, 4 }
  0xed   :  { %v381_v46 = vadd.f32 %v380_v37, %v364_v35 }
  0xef   :  { %v382_v53 = vrot.slane %v381_v46, 2 }
  0xf1   :  { %v272_v24 = vpop.permute.xlu2 %271  ;;  %v383_v61 = vadd.f32 %v382_v53, %v381_v46 }
  0xf2   :  { %v366_v38 = vsel %vm238_vm10, %v272_v24, 0.0  ;;  %vm523_vm10 = vcmask 1044484  }
  0xf3   :  { %v392_v40 = vrot.slane %v366_v38, 4  ;;  %v384_v13 = vrot.slane %v383_v61, 1 }
  0xf5   :  { %v393_v51 = vadd.f32 %v392_v40, %v366_v38  ;;  %v385_v25 = vadd.f32 %v384_v13, %v383_v61 }
  0xf7   :  { %v394_v57 = vrot.slane %v393_v51, 2 }
  0xf8   :  { %477 = vadd.xlane.f32.xlu2 %v476_v28 }
  0xf9   :  { %v279_v33 = vpop.permute.xlu2 %278  ;;  %v395_v7 = vadd.f32 %v394_v57, %v393_v51 }
  0xfa   :  { %v367_v41 = vsel %vm239_vm11, %v279_v33, 0.0  ;;  %vm525_vm11 = vcmask 1045509  }
  0xfb   :  { %v398_v49 = vrot.slane %v367_v41, 4  ;;  %v396_v21 = vrot.slane %v395_v7, 1 }
  0xfd   :  { %v399_v56 = vadd.f32 %v398_v49, %v367_v41  ;;  %v397_v12 = vadd.f32 %v396_v21, %v395_v7 }
  0xff   :  { %v400_v4 = vrot.slane %v399_v56, 2 }
 0x101   :  { %v286_v42 = vpop.permute.xlu2 %285  ;;  %v265_v43 = vpop.permute.xlu0 %264  ;;  %v401_v18 = vadd.f32 %v400_v4, %v399_v56 }
 0x102   :  { %v365_v47 = vsel %vm237_vm12, %v265_v43, 0.0  ;;  %v368_v50 = vsel %vm240_vm13, %v286_v42, 0.0  ;;  %vm527_vm12 = vcmask 1046534   ;;  %vm529_vm13 = vcmask 1047559  }
 0x103   :  { %v386_v48 = vrot.slane %v365_v47, 4  ;;  %v404_v54 = vrot.slane %v368_v50, 4  ;;  %v402_v35 = vrot.slane %v401_v18, 1 }
 0x105   :  { %v387_v52 = vadd.f32 %v386_v48, %v365_v47  ;;  %v405_v2 = vadd.f32 %v404_v54, %v368_v50  ;;  %v403_v43 = vadd.f32 %v402_v35, %v401_v18 }
 0x107   :  { %v388_v55 = vrot.slane %v387_v52, 2  ;;  %v406_v16 = vrot.slane %v405_v2, 2 }
 0x109   :  { %v389_v58 = vadd.f32 %v388_v55, %v387_v52  ;;  %v293_v59 = vpop.permute.xlu2 %292  ;;  %v307_v60 = vpop.permute.xlu0 %306  ;;  %v407_v31 = vadd.f32 %v406_v16, %v405_v2 }
 0x10a   :  { %v369_v62 = vsel %vm241_vm14, %v293_v59, 0.0  ;;  %v314_v63 = vpop.permute.xlu1 %313  ;;  %v371_v0 = vsel %vm243_vm15, %v307_v60, 0.0  ;;  %vm248_vm14 = vcmp.eq.s32.totalorder %v1285_v11, %v1331_v30 }
 0x10b   :  { %v410_v3 = vrot.slane %v369_v62, 4  ;;  %v390_v5 = vrot.slane %v389_v58, 1  ;;  %v422_v6 = vrot.slane %v371_v0, 4  ;;  %v372_v10 = vsel %vm244_vm0, %v314_v63, 0.0 }
 0x10c   :  { %v428_v20 = vrot.slane %v372_v10, 4  ;;  %v408_v40 = vrot.slane %v407_v31, 1  ;;  %vm571_vm0 = vcmask 261120  }
 0x10d   :  { %v411_v8 = vadd.f32 %v410_v3, %v369_v62  ;;  %v423_v15 = vadd.f32 %v422_v6, %v371_v0  ;;  %v391_v19 = vadd.f32 %v390_v5, %v389_v58 }
 0x10e   :  { %v429_v36 = vadd.f32 %v428_v20, %v372_v10  ;;  %v409_v55 = vadd.f32 %v408_v40, %v407_v31 }
 0x10f   :  { %v412_v17 = vrot.slane %v411_v8, 2  ;;  %v424_v27 = vrot.slane %v423_v15, 2  ;;  %v518_v14 = vsel %vm517_vm3, %v391_v19, %v385_v25 }
 0x110   :  { %v520_v42 = vsel %vm519_vm5, %v397_v12, %v518_v14  ;;  %v430_v44 = vrot.slane %v429_v36, 2 }
 0x111   :  { %v300_v23 = vpop.permute.xlu2 %299  ;;  %v335_v24 = vpop.permute.xlu0 %334  ;;  %v413_v26 = vadd.f32 %v412_v17, %v411_v8  ;;  %v425_v22 = vadd.f32 %v424_v27, %v423_v15  ;;  %v522_v54 = vsel %vm521_vm8, %v403_v43, %v520_v42 }
 0x112   :  { %v370_v28 = vsel %vm242_vm1, %v300_v23, 0.0  ;;  %v328_v29 = vpop.permute.xlu1 %327  ;;  %v375_v38 = vsel %vm247_vm4, %v335_v24, 0.0  ;;  %v431_v60 = vadd.f32 %v430_v44, %v429_v36  ;;  %v524_v9 = vsel %vm523_vm10, %v409_v55, %v522_v54  ;;  %vm1442_vm1 = vmneg %vm571_vm0 }
 0x113   :  { %v416_v33 = vrot.slane %v370_v28, 4  ;;  %v374_v34 = vsel %vm246_vm2, %v328_v29, 0.0  ;;  %v414_v39 = vrot.slane %v413_v26, 1  ;;  %v446_v46 = vrot.slane %v375_v38, 4 }
 0x114   :  { %v440_v37 = vrot.slane %v374_v34, 4  ;;  %v426_v51 = vrot.slane %v425_v22, 1  ;;  %v432_v17 = vrot.slane %v431_v60, 1  ;;  %vm730_vm2 = vcmask 523264  }
 0x115   :  { %v417_v1 = vadd.f32 %v416_v33, %v370_v28  ;;  %v415_v50 = vadd.f32 %v414_v39, %v413_v26  ;;  %v447_v61 = vadd.f32 %v446_v46, %v375_v38 }
 0x116   :  { %v441_v48 = vadd.f32 %v440_v37, %v374_v34  ;;  %v427_v4 = vadd.f32 %v426_v51, %v425_v22  ;;  %v433_v27 = vadd.f32 %v432_v17, %v431_v60  ;;  %v563_v60 = vld [vmem:[%s1616_s5] sm:$0xff] }
 0x117   :  { %v418_v41 = vrot.slane %v417_v1, 2  ;;  %v526_v5 = vsel %vm525_vm11, %v415_v50, %v524_v9  ;;  %v448_v7 = vrot.slane %v447_v61, 2  ;;  %v1014_v9 = vld [vmem:[%s1618_s7 + $0x38] sm:$0xff]  ;;  %v1011_v17 = vld [vmem:[%s1618_s7 + $0x20] sm:$0xff] }
 0x118   :  { %v442_v63 = vrot.slane %v441_v48, 2  ;;  %626 = vrot.lane.b32.xlu1 %v1014_v9, %s1140_s25 }
 0x119   :  { %v419_v47 = vadd.f32 %v418_v41, %v417_v1  ;;  %v321_v49 = vpop.permute.xlu2 %320  ;;  %v356_v59 = vpop.permute.xlu0 %355  ;;  %v449_v21 = vadd.f32 %v448_v7, %v447_v61  ;;  %v1066_v61 = vld [vmem:[%s1615_s4 + $0x1] ss:$0 sm:$0xff] }
 0x11a   :  { %v373_v52 = vsel %vm245_vm6, %v321_v49, 0.0  ;;  %v349_v53 = vpop.permute.xlu1 %348  ;;  %v378_v3 = vsel %vm250_vm9, %v356_v59, 0.0  ;;  %v443_v10 = vadd.f32 %v442_v63, %v441_v48  ;;  %v564_v59 = vld [vmem:[%s1616_s5 + $0x8] sm:$0xff]  ;;  %v1065_v63 = vld [vmem:[%s1615_s4] ss:$0 sm:$0xff]  ;;  %s1143_s4 = smov 96  }
 0x11b   :  { %v420_v56 = vrot.slane %v419_v47, 1  ;;  %v434_v57 = vrot.slane %v373_v52, 4  ;;  %v377_v58 = vsel %vm249_vm7, %v349_v53, 0.0  ;;  %v464_v15 = vrot.slane %v378_v3, 4 }
 0x11c   :  { %v458_v2 = vrot.slane %v377_v58, 4  ;;  %v444_v23 = vrot.slane %v443_v10, 1  ;;  %v450_v31 = vrot.slane %v449_v21, 1  ;;  %v487_v7 = vmul.f32 0.0, %v1065_v63 }
 0x11d   :  { %v421_v62 = vadd.f32 %v420_v56, %v419_v47  ;;  %v435_v0 = vadd.f32 %v434_v57, %v373_v52  ;;  %v465_v25 = vadd.f32 %v464_v15, %v378_v3  ;;  %v566_v57 = vld [vmem:[%s1616_s5 + $0x18] sm:$0xff] }
 0x11e   :  { %v459_v32 = vadd.f32 %v458_v2, %v377_v58  ;;  %v445_v33 = vadd.f32 %v444_v23, %v443_v10  ;;  %v451_v39 = vadd.f32 %v450_v31, %v449_v21  ;;  %v565_v58 = vld [vmem:[%s1616_s5 + $0x10] sm:$0xff]  ;;  %590 = vmatpush.msra.mxu1 %v566_v57  ;;  %s1146_s5 = smov 8  }
 0x11f   :  { %v436_v45 = vrot.slane %v435_v0, 2  ;;  %v528_v6 = vsel %vm527_vm12, %v421_v62, %v526_v5  ;;  %v466_v34 = vrot.slane %v465_v25, 2  ;;  %v495_v62 = vmul.f32 0.0, %v1066_v61 }
 0x120   :  { %v530_v8 = vsel %vm529_vm13, %v427_v4, %v528_v6  ;;  %v460_v28 = vrot.slane %v459_v32, 2  ;;  %591 = vmatpush.msra.mxu1 %v565_v58  ;;  %v1012_v6 = vld [vmem:[%s1618_s7 + $0x28] sm:$0xff] }
 0x121   :  { %v437_v13 = vadd.f32 %v436_v45, %v435_v0  ;;  %v342_v16 = vpop.permute.xlu2 %341  ;;  %556 = vmatmul.f32.vlgmr.msra.gmra.mxu0 %v530_v8  ;;  %v467_v40 = vadd.f32 %v466_v34, %v465_v25  ;;  %v497_v0 = vadd.f32 %v1065_v63, %v495_v62  ;;  %v1013_v45 = vld [vmem:[%s1618_s7 + $0x30] sm:$0xff]  ;;  %v498_v8 = vadd.f32 %v1066_v61, %v487_v7  ;;  %v604_v34 = vld [vmem:[%s1618_s7 + $0x8] sm:$0xff] }
 0x122   :  { %v376_v18 = vsel %vm248_vm14, %v342_v16, 0.0  ;;  %v461_v36 = vadd.f32 %v460_v28, %v459_v32  ;;  %v363_v12 = vpop.permute.xlu1 %362  ;;  %592 = vmatpush.msra.mxu1 %v564_v59  ;;  %624 = vrot.lane.b32.xlu1 %v1013_v45, %s1140_s25  ;;  %v1067_v32 = vld [vmem:[%s1617_s6] ss:$0 sm:$0xff]  ;;  %vm965_vm14 = vcmask 531456  }
 0x123   :  { %v438_v19 = vrot.slane %v437_v13, 1  ;;  %v452_v20 = vrot.slane %v376_v18, 4  ;;  %v468_v48 = vrot.slane %v467_v40, 1 }
 0x124   :  { %v462_v42 = vrot.slane %v461_v36, 1  ;;  %593 = vmatpush.msra.mxu1 %v563_v60 }
 0x125   :  { %v439_v24 = vadd.f32 %v438_v19, %v437_v13  ;;  %v453_v26 = vadd.f32 %v452_v20, %v376_v18  ;;  %v469_v53 = vadd.f32 %v468_v48, %v467_v40 }
 0x126   :  { %v463_v49 = vadd.f32 %v462_v42, %v461_v36  ;;  %v1018_v36 = vld [vmem:[%s1622_s11 + $0x38] sm:$0xff] }
 0x127   :  { %v454_v29 = vrot.slane %v453_v26, 2  ;;  %v531_v11 = vsel %vm517_vm3, %v439_v24, %v433_v27  ;;  %659 = vrot.lane.b32.xlu0 %v1018_v36, %s1140_s25  ;;  %vm719_vm3 = vcmp.lt.s32.totalorder %v1331_v30, 32  ;;  %v639_v36 = vld [vmem:[%s1622_s11 + $0x18] sm:$0xff] }
 0x128   :  { %v532_v38 = vsel %vm519_vm5, %v445_v33, %v531_v11  ;;  %v606_v11 = vld [vmem:[%s1618_s7 + $0x18] sm:$0xff]  ;;  %v605_v33 = vld [vmem:[%s1618_s7 + $0x10] sm:$0xff] }
 0x129   :  { %v455_v35 = vadd.f32 %v454_v29, %v453_v26  ;;  %v235_v14 = vpop.permute.xlu2 %234  ;;  %v533_v44 = vsel %vm521_vm8, %v451_v39, %v532_v38  ;;  %v1016_v38 = vld [vmem:[%s1622_s11 + $0x28] sm:$0xff] }
 0x12a   :  { %vm251_vm15 = vcmp.eq.s32.totalorder %v235_v14, %v1331_v30  ;;  %622 = vrot.lane.b32.xlu1 %v1012_v6, %s1140_s25  ;;  %v1068_v14 = vld [vmem:[%s1619_s8 + $0x1] ss:$0 sm:$0xff] }
 0x12b   :  { %v456_v1 = vrot.slane %v455_v35, 1  ;;  %v379_v37 = vsel %vm251_vm15, %v363_v12, 0.0  ;;  %v1015_v12 = vld [vmem:[%s1622_s11 + $0x20] sm:$0xff] }
 0x12c   :  { %v470_v22 = vrot.slane %v379_v37, 4 }
 0x12d   :  { %v457_v41 = vadd.f32 %v456_v1, %v455_v35  ;;  %v603_v35 = vld [vmem:[%s1618_s7] sm:$0xff] }
 0x12e   :  { %v471_v43 = vadd.f32 %v470_v22, %v379_v37  ;;  %v1069_v1 = vld [vmem:[%s1620_s9 + $0x1] ss:$0 sm:$0xff]  ;;  %v1017_v37 = vld [vmem:[%s1622_s11 + $0x30] sm:$0xff] }
 0x12f   :  { %v534_v46 = vsel %vm523_vm10, %v457_v41, %v533_v44  ;;  %692 = vrot.lane.b32.xlu0 %v1069_v1, %s1140_s25  ;;  %v1070_v22 = vld [vmem:[%s1621_s10 + $0x1] ss:$0 sm:$0xff]  ;;  %v1141_v44 = vmov 0.0   ;;  %v638_v1 = vld [vmem:[%s1622_s11 + $0x10] sm:$0xff] }
 0x130   :  { %v472_v47 = vrot.slane %v471_v43, 2  ;;  %v535_v52 = vsel %vm525_vm11, %v463_v49, %v534_v46  ;;  %v1023_v46 = vsel %vm719_vm3, 1.0, %v1141_v44 }
 0x131   :  { %v536_v55 = vsel %vm527_vm12, %v469_v53, %v535_v52  ;;  %v724_v49 = vsub.f32 1.0, %v1023_v46  ;;  %v1142_v52 = vmov 8.0  }
 0x132   :  { %v473_v50 = vadd.f32 %v472_v47, %v471_v43  ;;  %620 = vrot.lane.b32.xlu1 %v1011_v17, %s1140_s25  ;;  %v669_v47 = vld [vmem:[%s1619_s8] sm:$0x1] }
 0x134   :  { %v474_v51 = vrot.slane %v473_v50, 1 }
 0x136   :  { %v475_v54 = vadd.f32 %v474_v51, %v473_v50 }
 0x138   :  { %v537_v56 = vsel %vm529_vm13, %v475_v54, %v536_v55  ;;  %v725_v54 = vmul.f32 0.0, %v724_v49  ;;  %v723_v55 = vmul.f32 0.0, %v1023_v46 }
 0x139   :  { %559 = vmatmul.f32.gmra.mxu0 %v537_v56 }
 0x13a   :  { %v727_v56 = vadd.f32 %v1023_v46, %v725_v54  ;;  %v728_v30 = vadd.f32 %v724_v49, %v723_v55  ;;  %v687_v46 = vld [vmem:[%s1620_s9] sm:$0x1] }
 0x13b   :  { %v696_v49 = vld [vmem:[%s1621_s10] sm:$0x1] }
 0x144   :  { %v481_v10 = vpop.xlane.xlu0 %480 }
 0x145   :  { %v500_v13 = vmul.f32 %v498_v8, %v481_v10 }
 0x16b   :  { %v478_v2 = vpop.xlane.xlu2 %477 }
 0x16c   :  { %v499_v3 = vmul.f32 %v497_v0, %v478_v2 }
 0x18a   :  { %v627_v20 = vpop.permute.xlu1 %626 }
 0x18b   :  { %1025 = vmatpush.msk.msra.mxu2 %vm1442_vm1, %v627_v20 }
 0x194   :  { %v625_v25 = vpop.permute.xlu1 %624 }
 0x195   :  { %1027 = vmatpush.msk.msra.mxu2 %vm1442_vm1, %v625_v25 }
 0x19c   :  { %v623_v26 = vpop.permute.xlu1 %622 }
 0x19d   :  { %1029 = vmatpush.msk.msra.mxu2 %vm1442_vm1, %v623_v26 }
 0x19e   :  { %v557_v4 = vpop.f32.mrf.mxu0 }
 0x19f   :  { %v558_v5 = vadd.f32 %v557_v4, %v499_v3 }
 0x1a1   :  { %1009 = vmatmul.msk.f32.vlgmr.msra.gmra.mxu1 %vm571_vm0, %v558_v5 }
 0x1a4   :  { %v621_v31 = vpop.permute.xlu1 %620 }
 0x1a5   :  { %1031 = vmatpush.msk.msra.mxu2 %vm1442_vm1, %v621_v31 }
 0x1a7   :  { %1032 = vmatpush.msk.msra.mxu2 %vm571_vm0, %v606_v11 }
 0x1a9   :  { %1033 = vmatpush.msk.msra.mxu2 %vm571_vm0, %v605_v33 }
 0x1ab   :  { %1034 = vmatpush.msk.msra.mxu2 %vm571_vm0, %v604_v34 }
 0x1ad   :  { %1035 = vmatpush.msk.msra.mxu2 %vm571_vm0, %v603_v35 }
 0x1b6   :  { %v560_v15 = vpop.f32.mrf.mxu0 }
 0x1b7   :  { %v561_v16 = vadd.f32 %v560_v15, %v500_v13  ;;  %v660_v15 = vpop.permute.xlu0 %659 }
 0x1b8   :  { %1039 = vmatpush.msk.msra.mxu3 %vm1442_vm1, %v660_v15 }
 0x1b9   :  { %1010 = vmatmul.msk.f32.gmra.mxu1 %vm571_vm0, %v561_v16 }
 0x21e   :  { %v595_v18 = vpop.f32.mrf.mxu1 }
 0x21f   :  { %v596_v19 = vadd.f32 %v1067_v32, %v595_v18 }
 0x221   :  { %1076 = vtanh.f32 %v596_v19 }
 0x227   :  { %v1448_v23 = vpop.eup %1076 }
 0x228   :  { %v707_v24 = vmul.f32 0.0, %v1448_v23 }
 0x22a   :  { %711 = vrot.lane.b32.xlu1 %v707_v24, %s1140_s25 }
 0x232   :  { %674 = vrot.lane.b32.xlu1 %v1068_v14, %s1140_s25 }
 0x236   :  { %v598_v27 = vpop.f32.mrf.mxu1 }
 0x237   :  { %v599_v28 = vadd.f32 %v1067_v32, %v598_v27 }
 0x239   :  { %1078 = vtanh.f32 %v599_v28 }
 0x23a   :  { %657 = vrot.lane.b32.xlu1 %v1017_v37, %s1140_s25  ;;  %1080 = vrcp.f32 %v1142_v52  ;;  %v637_v37 = vld [vmem:[%s1622_s11 + $0x8] sm:$0xff] }
 0x23f   :  { %v1456_v29 = vpop.eup %1078 }
 0x240   :  { %713 = vrot.lane.b32.xlu2 %v1456_v29, %s1140_s25  ;;  %v706_v42 = vmul.f32 0.0, %v1456_v29  ;;  %v1081_v58 = vpop.eup %1080 }
 0x241   :  { %v772_v62 = vmul.f32 8.0, %v1081_v58  ;;  %vm776_vm4 = vweird.f32 %v1081_v58 }
 0x242   :  { %655 = vrot.lane.b32.xlu1 %v1016_v38, %s1140_s25  ;;  %v636_v38 = vld [vmem:[%s1622_s11] sm:$0xff]  ;;  %s989_s11 = sshll.u32 %s1147_s26, 4  ;;  %s990_s11 = int_to_ptr.vmem [resolvable:$true] %s989_s11 }
 0x243   :  { %v773_v2 = vsub.f32 1.0, %v772_v62 }
 0x245   :  { %v774_v5 = vmul.f32 %v1081_v58, %v773_v2 }
 0x247   :  { %v775_v7 = vadd.f32 %v1081_v58, %v774_v5 }
 0x248   :  { %653 = vrot.lane.b32.xlu2 %v1015_v12, %s1140_s25 }
 0x249   :  { %v777_v13 = vsel %vm776_vm4, %v1081_v58, %v775_v7 }
 0x24a   :  { %701 = vrot.lane.b32.xlu1 %v1070_v22, %s1140_s25 }
 0x29a   :  { %v714_v41 = vpop.permute.xlu2 %713 }
 0x29b   :  { %v718_v43 = vsel %vm571_vm0, %v706_v42, %v714_v41  ;;  %v1071_v41 = vld [vmem:[%s1623_s12 + $0x1] ss:$0 sm:$0xff] }
 0x29c   :  { %v712_v39 = vpop.permute.xlu1 %711  ;;  %683 = vrot.lane.b32.xlu2 %v1071_v41, %s1140_s25 }
 0x29d   :  { %v717_v40 = vsel %vm571_vm0, %v1448_v23, %v712_v39 }
 0x29e   :  { %1036 = vmatmul.msk.f32.vlgmr.msra.gmra.mxu2 %vm730_vm2, %v717_v40 }
 0x2a2   :  { %v654_v35 = vpop.permute.xlu2 %653 }
 0x2a4   :  { %v675_v48 = vpop.permute.xlu1 %674 }
 0x2a5   :  { %v677_v50 = vsel %vm571_vm0, %v669_v47, %v675_v48  ;;  %v693_v47 = vpop.permute.xlu0 %692 }
 0x2a6   :  { %1037 = vmatmul.msk.f32.gmra.mxu2 %vm730_vm2, %v718_v43  ;;  %v729_v53 = vperm.slane %v677_v50, 0  ;;  %v695_v52 = vsel %vm571_vm0, %v687_v46, %v693_v47  ;;  %v923_v47 = vld [vmem:[%s1625_s14 + $0x18] sm:$0xff] }
 0x2a7   :  { %v808_v55 = vperm.slane %v695_v52, 0  ;;  %938 = vmatpush.msrb.mxu1 %v923_v47  ;;  %v918_v52 = vld [vmem:[%s1624_s13 + $0x10] sm:$0xff] }
 0x2ac   :  { %v658_v17 = vpop.permute.xlu1 %657 }
 0x2ad   :  { %1041 = vmatpush.msk.msra.mxu3 %vm1442_vm1, %v658_v17 }
 0x2b4   :  { %v656_v27 = vpop.permute.xlu1 %655 }
 0x2b5   :  { %1043 = vmatpush.msk.msra.mxu3 %vm1442_vm1, %v656_v27 }
 0x2b7   :  { %1045 = vmatpush.msk.msra.mxu3 %vm1442_vm1, %v654_v35 }
 0x2b9   :  { %1046 = vmatpush.msk.msra.mxu3 %vm571_vm0, %v639_v36 }
 0x2bb   :  { %1047 = vmatpush.msk.msra.mxu3 %vm571_vm0, %v638_v1 }
 0x2bc   :  { %v702_v50 = vpop.permute.xlu1 %701 }
 0x2bd   :  { %1048 = vmatpush.msk.msra.mxu3 %vm571_vm0, %v637_v37  ;;  %v704_v54 = vsel %vm571_vm0, %v696_v49, %v702_v50  ;;  %v921_v49 = vld [vmem:[%s1625_s14 + $0x8] sm:$0xff]  ;;  %v920_v50 = vld [vmem:[%s1625_s14] sm:$0xff] }
 0x2be   :  { %v811_v58 = vperm.slane %v704_v54, 0 }
 0x2bf   :  { %1049 = vmatpush.msk.msra.mxu3 %vm571_vm0, %v636_v38 }
 0x2f6   :  { %v684_v2 = vpop.permute.xlu2 %683 }
 0x321   :  { %v754_v51 = vpop.f32.mrf.mxu2 }
 0x322   :  { %v755_v57 = vadd.f32 %v754_v51, %v729_v53 }
 0x324   :  { %v760_v60 = vmul.f32 %v755_v57, %v727_v56 }
 0x326   :  { %v762_v0 = vsel %vm730_vm2, %v760_v60, 0.0 }
 0x329   :  { %v757_v59 = vpop.f32.mrf.mxu2 }
 0x32a   :  { %v758_v61 = vadd.f32 %v757_v59, %v729_v53 }
 0x32c   :  { %v761_v63 = vmul.f32 %v758_v61, %v728_v30 }
 0x32e   :  { %v763_v9 = vsel %vm730_vm2, %v761_v63, 0.0 }
 0x32f   :  { %v764_v3 = vadd.f32 %v763_v9, %v762_v0  ;;  %v678_v9 = vld [vmem:[%s1623_s12] sm:$0x1] }
 0x331   :  { %v765_v4 = vrot.slane %v764_v3, 4 }
 0x333   :  { %v766_v45 = vadd.f32 %v765_v4, %v764_v3  ;;  %v686_v3 = vsel %vm571_vm0, %v678_v9, %v684_v2 }
 0x334   :  { %v816_v4 = vperm.slane %v686_v3, 0 }
 0x335   :  { %v767_v6 = vrot.slane %v766_v45, 2 }
 0x337   :  { %v768_v8 = vadd.f32 %v767_v6, %v766_v45 }
 0x339   :  { %v769_v10 = vrot.slane %v768_v8, 1 }
 0x33b   :  { %v770_v16 = vadd.f32 %v769_v10, %v768_v8 }
 0x33d   :  { %v778_v32 = vmul.f32 %v777_v13, %v770_v16 }
 0x33f   :  { %v779_v18 = vsub.f32 %v755_v57, %v778_v32  ;;  %v780_v19 = vsub.f32 %v758_v61, %v778_v32 }
 0x341   :  { %v781_v20 = vmul.f32 %v779_v18, %v779_v18  ;;  %v782_v24 = vmul.f32 %v780_v19, %v780_v19 }
 0x343   :  { %v783_v25 = vmul.f32 %v781_v20, %v727_v56  ;;  %v784_v26 = vmul.f32 %v782_v24, %v728_v30 }
 0x345   :  { %v785_v28 = vsel %vm730_vm2, %v783_v25, 0.0  ;;  %v786_v31 = vsel %vm730_vm2, %v784_v26, 0.0 }
 0x346   :  { %v787_v11 = vadd.f32 %v786_v31, %v785_v28 }
 0x348   :  { %v788_v33 = vrot.slane %v787_v11, 4 }
 0x34a   :  { %v789_v34 = vadd.f32 %v788_v33, %v787_v11 }
 0x34c   :  { %v790_v14 = vrot.slane %v789_v34, 2 }
 0x34e   :  { %v791_v12 = vadd.f32 %v790_v14, %v789_v34 }
 0x350   :  { %v792_v21 = vrot.slane %v791_v12, 1 }
 0x352   :  { %v793_v39 = vadd.f32 %v792_v21, %v791_v12 }
 0x354   :  { %v794_v22 = vmul.f32 %v793_v39, %v777_v13 }
 0x356   :  { %v795_v40 = vadd.f32 1e-05, %v794_v22 }
 0x358   :  { %1082 = vrsqrt.f32 %v795_v40  ;;  %vm802_vm6 = vweird.f32 %v795_v40 }
 0x35e   :  { %v1083_v42 = vpop.eup %1082 }
 0x35f   :  { %v797_v43 = vmul.f32 %v1083_v42, %v795_v40  ;;  %vm803_vm5 = vweird.f32 %v1083_v42 }
 0x360   :  { %vm804_vm7 = vmor %vm802_vm6, %vm803_vm5 }
 0x361   :  { %v798_v44 = vmul.f32 %v1083_v42, %v797_v43 }
 0x363   :  { %v799_v48 = vmul.f32 0.5, %v798_v44 }
 0x365   :  { %v800_v51 = vsub.f32 1.5, %v799_v48  ;;  %v922_v48 = vld [vmem:[%s1625_s14 + $0x10] sm:$0xff] }
 0x366   :  { %939 = vmatpush.msrb.mxu1 %v922_v48 }
 0x367   :  { %v801_v53 = vmul.f32 %v1083_v42, %v800_v51  ;;  %v919_v51 = vld [vmem:[%s1624_s13 + $0x18] sm:$0xff] }
 0x368   :  { %940 = vmatpush.msrb.mxu1 %v921_v49 }
 0x369   :  { %v805_v56 = vsel %vm804_vm7, %v1083_v42, %v801_v53 }
 0x36a   :  { %v806_v57 = vmul.f32 %v805_v56, %v779_v18  ;;  %v807_v30 = vmul.f32 %v805_v56, %v780_v19  ;;  %941 = vmatpush.msrb.mxu1 %v920_v50  ;;  %v916_v56 = vld [vmem:[%s1624_s13] sm:$0xff] }
 0x36c   :  { %v809_v59 = vmul.f32 %v808_v55, %v806_v57  ;;  %v810_v61 = vmul.f32 %v808_v55, %v807_v30  ;;  %942 = vmatpush.msrb.mxu1 %v919_v51  ;;  %v917_v55 = vld [vmem:[%s1624_s13 + $0x8] sm:$0xff]  ;;  %s1144_s13 = smov [#allocation2]  }
 0x36e   :  { %v812_v60 = vadd.f32 %v811_v58, %v809_v59  ;;  %v813_v63 = vadd.f32 %v811_v58, %v810_v61  ;;  %943 = vmatpush.msrb.mxu1 %v918_v52 }
 0x370   :  { %v814_v62 = vmax.f32 %v812_v60, 0.0  ;;  %v815_v0 = vmax.f32 %v813_v63, 0.0  ;;  %944 = vmatpush.msrb.mxu1 %v917_v55 }
 0x372   :  { %1050 = vmatmul.msk.f32.vlgmr.msra.gmra.mxu3 %vm730_vm2, %v814_v62  ;;  %945 = vmatpush.msrb.mxu1 %v916_v56 }
 0x37a   :  { %1051 = vmatmul.msk.f32.gmra.mxu3 %vm730_vm2, %v815_v0 }
 0x3f5   :  { %v840_v5 = vpop.f32.mrf.mxu3 }
 0x3f6   :  { %v841_v45 = vadd.f32 %v840_v5, %v816_v4 }
 0x3f8   :  { %v848_v6 = vmul.f32 0.0, %v841_v45 }
 0x3fa   :  { %852 = vrot.lane.b32.xlu0 %v848_v6, %s1143_s4 }
 0x3fd   :  { %v843_v7 = vpop.f32.mrf.mxu3 }
 0x3fe   :  { %v844_v8 = vadd.f32 %v843_v7, %v816_v4 }
 0x400   :  { %854 = vrot.lane.b32.xlu1 %v844_v8, %s1143_s4  ;;  %v847_v16 = vmul.f32 0.0, %v844_v8 }
 0x46c   :  { %v853_v10 = vpop.permute.xlu0 %852 }
 0x46d   :  { %v858_v13 = vadd.f32 %v853_v10, %v841_v45 }
 0x46f   :  { %v860_v15 = vmul.f32 %v858_v13, %v858_v13 }
 0x471   :  { %v862_v17 = vsel %vm571_vm0, %v860_v15, 0.0 }
 0x472   :  { %v855_v32 = vpop.permute.xlu1 %854  ;;  %863 = vadd.xlane.f32.xlu2 %v862_v17 }
 0x473   :  { %v859_v18 = vadd.f32 %v855_v32, %v847_v16 }
 0x475   :  { %v861_v19 = vmul.f32 %v859_v18, %v859_v18 }
 0x477   :  { %v865_v20 = vsel %vm571_vm0, %v861_v19, 0.0 }
 0x478   :  { %866 = vadd.xlane.f32.xlu0 %v865_v20 }
 0x4e5   :  { %v864_v24 = vpop.xlane.xlu2 %863 }
 0x4e6   :  { %v868_v25 = vmax.f32 %v864_v24, 1e-24 }
 0x4e8   :  { %1084 = vrsqrt.f32 %v868_v25  ;;  %vm876_vm9 = vweird.f32 %v868_v25 }
 0x4eb   :  { %v867_v26 = vpop.xlane.xlu0 %866 }
 0x4ec   :  { %v869_v27 = vmax.f32 %v867_v26, 1e-24 }
 0x4ee   :  { %v1085_v28 = vpop.eup %1084  ;;  %1086 = vrsqrt.f32 %v869_v27  ;;  %vm886_vm12 = vweird.f32 %v869_v27 }
 0x4ef   :  { %v871_v31 = vmul.f32 %v1085_v28, %v868_v25  ;;  %vm877_vm8 = vweird.f32 %v1085_v28 }
 0x4f0   :  { %vm878_vm10 = vmor %vm876_vm9, %vm877_vm8 }
 0x4f1   :  { %v872_v11 = vmul.f32 %v1085_v28, %v871_v31 }
 0x4f3   :  { %v873_v33 = vmul.f32 0.5, %v872_v11 }
 0x4f4   :  { %v1087_v34 = vpop.eup %1086 }
 0x4f5   :  { %v874_v35 = vsub.f32 1.5, %v873_v33  ;;  %v881_v14 = vmul.f32 %v1087_v34, %v869_v27  ;;  %vm887_vm11 = vweird.f32 %v1087_v34 }
 0x4f6   :  { %vm888_vm13 = vmor %vm886_vm12, %vm887_vm11 }
 0x4f7   :  { %v882_v36 = vmul.f32 %v1087_v34, %v881_v14  ;;  %v875_v12 = vmul.f32 %v1085_v28, %v874_v35 }
 0x4f9   :  { %v883_v1 = vmul.f32 0.5, %v882_v36  ;;  %v879_v37 = vsel %vm878_vm10, %v1085_v28, %v875_v12 }
 0x4fa   :  { %v890_v21 = vmul.f32 %v879_v37, %v858_v13 }
 0x4fb   :  { %v884_v38 = vsub.f32 1.5, %v883_v1 }
 0x4fc   :  { %955 = vrot.lane.b32.xlu0 %v890_v21, %s1140_s25  ;;  %v892_v39 = vmul.f32 14.285714, %v890_v21 }
 0x4fd   :  { %v885_v22 = vmul.f32 %v1087_v34, %v884_v38 }
 0x4fe   :  { %v904_v40 = vmul.f32 0.0, %v892_v39 }
 0x4ff   :  { %v889_v41 = vsel %vm888_vm13, %v1087_v34, %v885_v22 }
 0x500   :  { %v891_v42 = vmul.f32 %v889_v41, %v859_v18  ;;  %908 = vrot.lane.b32.xlu1 %v904_v40, %s1140_s25 }
 0x502   :  { %v893_v43 = vmul.f32 14.285714, %v891_v42  ;;  %v894_v53 = vmul.f32 %v892_v39, %v891_v42 }
 0x504   :  { %v895_v44 = vmul.f32 %v893_v43, %v890_v21  ;;  %v896_v54 = vsel %vm571_vm0, %v894_v53, 0.0  ;;  %v903_v30 = vmul.f32 0.0, %v893_v43 }
 0x506   :  { %v899_v46 = vsel %vm571_vm0, %v895_v44, 0.0 }
 0x507   :  { %900 = vadd.xlane.f32.xlu2 %v899_v46 }
 0x508   :  { %910 = vrot.lane.b32.xlu1 %v893_v43, %s1140_s25 }
 0x51f   :  { %957 = vrot.lane.b32.xlu2 %v891_v42, %s1140_s25  ;;  %s976_s25 = sshll.u32 %s1144_s13, 4  ;;  %s977_s25 = int_to_ptr.vmem [resolvable:$true] %s976_s25 }
 0x532   :  { %897 = vadd.xlane.f32.xlu1 %v896_v54 }
 0x56e   :  { %v956_v2 = vpop.permute.xlu0 %955 }
 0x56f   :  { %v961_v3 = vsel %vm571_vm0, %v1448_v23, %v956_v2 }
 0x572   :  { %v909_v57 = vpop.permute.xlu1 %908 }
 0x573   :  { %v914_v58 = vsel %vm571_vm0, %v892_v39, %v909_v57 }
 0x574   :  { %1052 = vmatmul.msk.f32.vlgmr.msrb.gmra.mxu1 %vm730_vm2, %v914_v58 }
 0x57a   :  { %v911_v59 = vpop.permute.xlu1 %910  ;;  %v901_v60 = vpop.xlane.xlu2 %900 }
 0x57b   :  { %v915_v61 = vsel %vm571_vm0, %v903_v30, %v911_v59 }
 0x57c   :  { %1053 = vmatmul.msk.f32.gmra.mxu1 %vm730_vm2, %v915_v61 }
 0x582   :  { %v958_v62 = vpop.permute.xlu2 %957 }
 0x583   :  { %v962_v63 = vsel %vm571_vm0, %v1456_v29, %v958_v62 }
 0x584   :  { %v964_v0 = vsel %vm730_vm2, %v962_v63, %v901_v60 }
 0x585   :  { %v967_v9 = vsel %vm965_vm14, %v964_v0, 0.0 }
 0x586   :  { %969 = vst [vmem:[#allocation2 + $0x8] sm:$0xff] %v967_v9 }
 0x5a5   :  { %v898_v4 = vpop.xlane.xlu1 %897 }
 0x5a6   :  { %v963_v5 = vsel %vm730_vm2, %v961_v3, %v898_v4 }
 0x5a7   :  { %v966_v29 = vsel %vm965_vm14, %v963_v5, 0.0 }
 0x5a8   :  { %968 = vst [vmem:[#allocation2] sm:$0xff] %v966_v29 }
 0x5a9   :  { %984 = dma.vmem_to_hbm [thread:$0]  %s977_s25, 256, %s979_s23, [#allocation3], %s1145_s24, %s1145_s24, %s1146_s5  }
 0x5f1   :  { %v947_v45 = vpop.f32.mrf.mxu1 }
 0x5f2   :  { %970 = vst [vmem:[#allocation4] sm:$0xff] %v947_v45 }
 0x5f9   :  { %v950_v23 = vpop.f32.mrf.mxu1 }
 0x5fa   :  { %971 = vst [vmem:[#allocation4 + $0x8] sm:$0xff] %v950_v23 }
 0x5fb   :  { %997 = dma.vmem_to_hbm [thread:$0]  %s990_s11, 256, %s992_s15, [#allocation5], %s1145_s24, %s1145_s24, %s1146_s5  }
 0x5fc   :  { %1136 = dma.done.wait [#allocation3], 256  }
 0x5fd   :  { %1137 = vsyncadd [#allocation3], 4294967040 }
 0x5fe   :  { %1138 = dma.done.wait [#allocation5], 256  }
 0x5ff   :  { %1139 = vsyncadd [#allocation5], 4294967040 }
 0x600   :  { %1006 = vsyncpa [#allocation3], 1 }
 0x601   :  { %1007 = vsyncpa [#allocation5], 1 }

</bundles_post_ra>
